<compile_context>
chip_gen: v5e
topology: v5e:2x2
jax: 0.10.0
libtpu: 0.0.40
codegen_flags: <defaults>
</compile_context>

<pallas_src>
import jax
import jax.numpy as jnp
import numpy as np
from jax.experimental import pallas as pl
from jax.experimental.pallas import tpu as pltpu


def _final_speaker_kernel(
    xce_ref,                                   # (tile, input_dim + 2L) bf16: [x | cmu | eps]
    w1_ref, b1_ref,                            # (input_dim + 2L, 512) bf16, (1, 512) f32
    we2_ref, be2_ref,                          # (512, 256) bf16, (1, 256) f32
    we3_ref, be3_ref,                          # (256, 2L) bf16, (1, 2L) f32
    wd1_ref, bd1_ref,                          # (L, 256) bf16, (1, 256) f32
    wd2_ref, bd2_ref,                          # (256, 512) bf16, (1, 512) f32
    wd3_ref, bd3_ref,                          # (512, L) bf16, (1, L) f32
    out_ref,                                   # (tile, 3L) f32: [recon | mu | logvar]
):
    f32, bf16 = jnp.float32, jnp.bfloat16

    xce = xce_ref[...]

    # Fused project_to_latent + (-content_mu) + encoder[0]: single K-dim matmul.
    h = jnp.dot(xce, w1_ref[...], preferred_element_type=f32) + b1_ref[...]
    h = jnp.maximum(h, 0.0)

    # encoder[2]: Linear(512, 256) + ReLU
    h = jnp.dot(h.astype(bf16), we2_ref[...], preferred_element_type=f32) + be2_ref[...]
    h = jnp.maximum(h, 0.0)

    # encoder[4]: one Linear(256, 2L); mu/logvar are static lane slices.
    ml = jnp.dot(h.astype(bf16), we3_ref[...], preferred_element_type=f32) + be3_ref[...]
    L = ml.shape[-1] // 2
    mu = ml[:, :L]
    logvar = ml[:, L:]

    # reparameterize: eps lives in the last L lanes of the packed input slab.
    eps = xce[:, xce.shape[-1] - L:].astype(f32)
    z = mu + eps * jnp.exp(0.5 * logvar)

    # decoder: Linear(L,256) ReLU, Linear(256,512) ReLU, Linear(512,L) Sigmoid
    d = jnp.dot(z.astype(bf16), wd1_ref[...], preferred_element_type=f32) + bd1_ref[...]
    d = jnp.maximum(d, 0.0)
    d = jnp.dot(d.astype(bf16), wd2_ref[...], preferred_element_type=f32) + bd2_ref[...]
    d = jnp.maximum(d, 0.0)
    logits = jnp.dot(d.astype(bf16), wd3_ref[...], preferred_element_type=f32) + bd3_ref[...]
    recon = jax.nn.sigmoid(logits)

    # Pack [recon | mu | logvar]: one store / one writeback DMA per grid step.
    out_ref[...] = jnp.concatenate([recon, mu, logvar], axis=-1).astype(out_ref.dtype)


_WEIGHT_ORDER = ("w1", "b1", "we2", "be2", "we3", "be3",
                 "wd1", "bd1", "wd2", "bd2", "wd3", "bd3")


def prepare_params(p):
    """Fold/cast PyTorch-style params into the kernel layout.

    All folds are done in f32 and cast ONCE to bf16; biases stay f32.
    """
    f32, bf16 = jnp.float32, jnp.bfloat16
    L = p["wp"].shape[1]
    n1 = p["we1"].shape[1]
    # relu(((x@wp + bp) - cmu) @ we1 + be1)
    #   = relu([x | cmu | eps] @ [[wp@we1]; [-we1]; [0]] + (bp@we1 + be1))
    w1 = jnp.concatenate(
        [p["wp"] @ p["we1"],                 # (input_dim, 512)
         -p["we1"],                          # (L, 512)  consumes content_mu
         jnp.zeros((L, n1), f32)],           # (L, 512)  eps lanes contribute 0
        axis=0)
    return {
        "w1": w1.astype(bf16),
        "b1": (p["bp"] @ p["we1"] + p["be1"]).astype(f32),
        "we2": p["we2"].astype(bf16), "be2": p["be2"].astype(f32),
        "we3": p["we3"].astype(bf16), "be3": p["be3"].astype(f32),
        "wd1": p["wd1"].astype(bf16), "bd1": p["bd1"].astype(f32),
        "wd2": p["wd2"].astype(bf16), "bd2": p["bd2"].astype(f32),
        "wd3": p["wd3"].astype(bf16), "bd3": p["bd3"].astype(f32),
    }


def _default_batch_tile(B):
    if B < 128:
        return B                              # tiny batch: single grid step
    # Largest multiple-of-8 divisor of B that is <= 1024 and leaves grid >= 2:
    # big tiles amortize the ~0.35us/step overhead and the serial matmul chain,
    # grid >= 2 lets the "parallel" batch axis shard across v7x's two TCs,
    # and tile <= 1024 keeps VMEM inside v5e's 16 MiB default scoped budget.
    best = None
    for d in range(8, min(B // 2, 1024) + 1, 8):
        if B % d == 0:
            best = d
    return best if best is not None else B


def final_speaker_layer(x, content_mu, eps, kparams, *, batch_tile=None):
    """x: (B, input_dim), content_mu/eps: (B, L). Returns (recon, mu, logvar)."""
    B, _ = x.shape
    L = content_mu.shape[-1]

    if batch_tile is None:
        batch_tile = _default_batch_tile(B)
    assert B % batch_tile == 0, "batch size must be divisible by batch_tile"
    grid = (B // batch_tile,)

    # Pack the three lane-sparse activations into one dense bf16 slab:
    # one input BlockSpec / DMA per step, no per-step casts inside the kernel.
    xce = jnp.concatenate([x, content_mu, eps], axis=-1).astype(jnp.bfloat16)
    d_packed = xce.shape[-1]

    weights = tuple(kparams[k] for k in _WEIGHT_ORDER)

    def w_spec(arr):
        # Constant block index -> the pipeline keeps the block resident (no
        # per-step re-fetch); default double-buffering costs < 1 MB here.
        return pl.BlockSpec(arr.shape, lambda *_: (0,) * arr.ndim)

    in_specs = ([pl.BlockSpec((batch_tile, d_packed), lambda i: (i, 0))]
                + [w_spec(w) for w in weights])
    out_specs = pl.BlockSpec((batch_tile, 3 * L), lambda i: (i, 0))

    compiler_params = pltpu.CompilerParams(
        dimension_semantics=("parallel",),
        # Only needed if a caller forces tiles past the default 1024-row cap
        # (v5e's 16 MiB default scoped-VMEM budget is the binding one).
        vmem_limit_bytes=(64 << 20) if batch_tile > 1024 else None,
    )

    packed = pl.pallas_call(
        _final_speaker_kernel,
        out_shape=jax.ShapeDtypeStruct((B, 3 * L), jnp.float32),
        grid_spec=pltpu.PrefetchScalarGridSpec(
            num_scalar_prefetch=0,
            grid=grid,
            in_specs=in_specs,
            out_specs=out_specs,
        ),
        compiler_params=compiler_params,
    )(xce, *weights)

    recon = packed[:, :L]
    mu = packed[:, L:2 * L]
    logvar = packed[:, 2 * L:]
    return recon, mu, logvar


def init_params(key, input_dim, latent_dim):
    """Deterministic synthetic init. Weights stored as (in, out) = PyTorch weight.T."""
    def lin(k, fan_in, fan_out):
        kw, kb = jax.random.split(k)
        w = jax.random.normal(kw, (fan_in, fan_out), jnp.float32) * 0.05
        b = jax.random.normal(kb, (1, fan_out), jnp.float32) * 0.05
        return w, b

    keys = jax.random.split(key, 7)
    p = {}
    p["wp"], p["bp"] = lin(keys[0], input_dim, latent_dim)        # project_to_latent
    p["we1"], p["be1"] = lin(keys[1], latent_dim, 512)            # encoder[0]
    p["we2"], p["be2"] = lin(keys[2], 512, 256)                   # encoder[2]
    p["we3"], p["be3"] = lin(keys[3], 256, 2 * latent_dim)        # encoder[4]
    p["wd1"], p["bd1"] = lin(keys[4], latent_dim, 256)            # decoder[0]
    p["wd2"], p["bd2"] = lin(keys[5], 256, 512)                   # decoder[2]
    p["wd3"], p["bd3"] = lin(keys[6], 512, latent_dim)            # decoder[4]
    return p


def _reference(x, content_mu, eps, p):
    """Pure-JAX f32 reference of the PyTorch forward (unfolded, unpacked)."""
    proj = x @ p["wp"] + p["bp"]
    s = proj - content_mu
    h = jax.nn.relu(s @ p["we1"] + p["be1"])
    h = jax.nn.relu(h @ p["we2"] + p["be2"])
    ml = h @ p["we3"] + p["be3"]
    L = content_mu.shape[-1]
    mu, logvar = ml[:, :L], ml[:, L:]
    z = mu + eps * jnp.exp(0.5 * logvar)
    d = jax.nn.relu(z @ p["wd1"] + p["bd1"])
    d = jax.nn.relu(d @ p["wd2"] + p["bd2"])
    recon = jax.nn.sigmoid(d @ p["wd3"] + p["bd3"])
    return recon, mu, logvar


if __name__ == "__main__":
    B, INPUT_DIM, LATENT_DIM = 16, 32, 16

    key = jax.random.PRNGKey(0)
    k_x, k_cmu, k_eps, k_p = jax.random.split(key, 4)
    x = jax.random.normal(k_x, (B, INPUT_DIM), jnp.float32)
    content_mu = jax.random.normal(k_cmu, (B, LATENT_DIM), jnp.float32)
    # Reparameterization noise (torch.randn_like equivalent), passed in so the
    # kernel stays deterministic.
    eps = jax.random.normal(k_eps, (B, LATENT_DIM), jnp.float32)

    params = init_params(k_p, INPUT_DIM, LATENT_DIM)
    kernel_params = prepare_params(params)

    recon, mu, logvar = final_speaker_layer(x, content_mu, eps, kernel_params)
    jax.block_until_ready((recon, mu, logvar))

    ref_recon, ref_mu, ref_logvar = _reference(x, content_mu, eps, params)
    # Tolerances account for bf16 weights/activations on the MXU vs. f32 reference.
    np.testing.assert_allclose(np.asarray(recon), np.asarray(ref_recon), rtol=5e-2, atol=1e-2)
    np.testing.assert_allclose(np.asarray(mu), np.asarray(ref_mu), rtol=5e-2, atol=1e-2)
    np.testing.assert_allclose(np.asarray(logvar), np.asarray(ref_logvar), rtol=5e-2, atol=1e-2)

    print("KERNEL_OK")
</pallas_src>

<mosaic_0001>
module attributes {stable_mosaic.version = 11 : i64} {
  func.func @_final_speaker_kernel(%arg0: i32, %arg1: memref<16x64xbf16, #tpu.memory_space<vmem>>, %arg2: memref<64x512xbf16, #tpu.memory_space<vmem>>, %arg3: memref<1x512xf32, #tpu.memory_space<vmem>>, %arg4: memref<512x256xbf16, #tpu.memory_space<vmem>>, %arg5: memref<1x256xf32, #tpu.memory_space<vmem>>, %arg6: memref<256x32xbf16, #tpu.memory_space<vmem>>, %arg7: memref<1x32xf32, #tpu.memory_space<vmem>>, %arg8: memref<16x256xbf16, #tpu.memory_space<vmem>>, %arg9: memref<1x256xf32, #tpu.memory_space<vmem>>, %arg10: memref<256x512xbf16, #tpu.memory_space<vmem>>, %arg11: memref<1x512xf32, #tpu.memory_space<vmem>>, %arg12: memref<512x16xbf16, #tpu.memory_space<vmem>>, %arg13: memref<1x16xf32, #tpu.memory_space<vmem>>, %arg14: memref<16x48xf32, #tpu.memory_space<vmem>>) attributes {dimension_semantics = [#tpu.dimension_semantics<parallel>], iteration_bounds = array<i64: 1>, scalar_prefetch = 0 : i64, scratch_operands = 0 : i64, tpu.core_type = #tpu.core_type<tc>, window_params = [{transform_indices = @transform_0, window_bounds = array<i64: 16, 64>}, {pipeline_mode = #tpu.pipeline_mode<synchronous>, transform_indices = @transform_1, window_bounds = array<i64: 64, 512>}, {pipeline_mode = #tpu.pipeline_mode<synchronous>, transform_indices = @transform_2, window_bounds = array<i64: 1, 512>}, {pipeline_mode = #tpu.pipeline_mode<synchronous>, transform_indices = @transform_3, window_bounds = array<i64: 512, 256>}, {pipeline_mode = #tpu.pipeline_mode<synchronous>, transform_indices = @transform_4, window_bounds = array<i64: 1, 256>}, {pipeline_mode = #tpu.pipeline_mode<synchronous>, transform_indices = @transform_5, window_bounds = array<i64: 256, 32>}, {pipeline_mode = #tpu.pipeline_mode<synchronous>, transform_indices = @transform_6, window_bounds = array<i64: 1, 32>}, {pipeline_mode = #tpu.pipeline_mode<synchronous>, transform_indices = @transform_7, window_bounds = array<i64: 16, 256>}, {pipeline_mode = #tpu.pipeline_mode<synchronous>, transform_indices = @transform_8, window_bounds = array<i64: 1, 256>}, {pipeline_mode = #tpu.pipeline_mode<synchronous>, transform_indices = @transform_9, window_bounds = array<i64: 256, 512>}, {pipeline_mode = #tpu.pipeline_mode<synchronous>, transform_indices = @transform_10, window_bounds = array<i64: 1, 512>}, {pipeline_mode = #tpu.pipeline_mode<synchronous>, transform_indices = @transform_11, window_bounds = array<i64: 512, 16>}, {pipeline_mode = #tpu.pipeline_mode<synchronous>, transform_indices = @transform_12, window_bounds = array<i64: 1, 16>}, {transform_indices = @transform_13, window_bounds = array<i64: 16, 48>}]} {
    %c0 = arith.constant 0 : index
    %c0_0 = arith.constant 0 : index
    %0 = vector.load %arg1[%c0, %c0_0] : memref<16x64xbf16, #tpu.memory_space<vmem>>, vector<16x64xbf16>
    %c0_1 = arith.constant 0 : index
    %c0_2 = arith.constant 0 : index
    %1 = vector.load %arg2[%c0_1, %c0_2] : memref<64x512xbf16, #tpu.memory_space<vmem>>, vector<64x512xbf16>
    %cst = arith.constant dense<0.000000e+00> : vector<16x512xf32>
    %2 = tpu.matmul %0, %1, %cst {dimension_numbers = #tpu.dot_dimension_numbers<[1], [0], [0], [1], [0, 0, 1, 1], [], []>} : vector<16x64xbf16>, vector<64x512xbf16>, vector<16x512xf32> -> vector<16x512xf32>
    %c0_3 = arith.constant 0 : index
    %c0_4 = arith.constant 0 : index
    %3 = vector.load %arg3[%c0_3, %c0_4] : memref<1x512xf32, #tpu.memory_space<vmem>>, vector<1x512xf32>
    %4 = vector.broadcast %3 : vector<1x512xf32> to vector<16x512xf32>
    %5 = arith.addf %2, %4 : vector<16x512xf32>
    %cst_5 = arith.constant 0.000000e+00 : f32
    %6 = vector.broadcast %cst_5 : f32 to vector<16x512xf32>
    %7 = arith.maximumf %5, %6 : vector<16x512xf32>
    %8 = arith.truncf %7 : vector<16x512xf32> to vector<16x512xbf16>
    %c0_6 = arith.constant 0 : index
    %c0_7 = arith.constant 0 : index
    %9 = vector.load %arg4[%c0_6, %c0_7] : memref<512x256xbf16, #tpu.memory_space<vmem>>, vector<512x256xbf16>
    %cst_8 = arith.constant dense<0.000000e+00> : vector<16x256xf32>
    %10 = tpu.matmul %8, %9, %cst_8 {dimension_numbers = #tpu.dot_dimension_numbers<[1], [0], [0], [1], [0, 0, 1, 1], [], []>} : vector<16x512xbf16>, vector<512x256xbf16>, vector<16x256xf32> -> vector<16x256xf32>
    %c0_9 = arith.constant 0 : index
    %c0_10 = arith.constant 0 : index
    %11 = vector.load %arg5[%c0_9, %c0_10] : memref<1x256xf32, #tpu.memory_space<vmem>>, vector<1x256xf32>
    %12 = vector.broadcast %11 : vector<1x256xf32> to vector<16x256xf32>
    %13 = arith.addf %10, %12 : vector<16x256xf32>
    %cst_11 = arith.constant 0.000000e+00 : f32
    %14 = vector.broadcast %cst_11 : f32 to vector<16x256xf32>
    %15 = arith.maximumf %13, %14 : vector<16x256xf32>
    %16 = arith.truncf %15 : vector<16x256xf32> to vector<16x256xbf16>
    %c0_12 = arith.constant 0 : index
    %c0_13 = arith.constant 0 : index
    %17 = vector.load %arg6[%c0_12, %c0_13] : memref<256x32xbf16, #tpu.memory_space<vmem>>, vector<256x32xbf16>
    %cst_14 = arith.constant dense<0.000000e+00> : vector<16x32xf32>
    %18 = tpu.matmul %16, %17, %cst_14 {dimension_numbers = #tpu.dot_dimension_numbers<[1], [0], [0], [1], [0, 0, 1, 1], [], []>} : vector<16x256xbf16>, vector<256x32xbf16>, vector<16x32xf32> -> vector<16x32xf32>
    %c0_15 = arith.constant 0 : index
    %c0_16 = arith.constant 0 : index
    %19 = vector.load %arg7[%c0_15, %c0_16] : memref<1x32xf32, #tpu.memory_space<vmem>>, vector<1x32xf32>
    %20 = vector.broadcast %19 : vector<1x32xf32> to vector<16x32xf32>
    %21 = arith.addf %18, %20 : vector<16x32xf32>
    %22 = vector.extract_strided_slice %21 {offsets = [0, 0], sizes = [16, 16], strides = [1, 1]} : vector<16x32xf32> to vector<16x16xf32>
    %23 = vector.extract_strided_slice %21 {offsets = [0, 16], sizes = [16, 16], strides = [1, 1]} : vector<16x32xf32> to vector<16x16xf32>
    %24 = vector.extract_strided_slice %0 {offsets = [0, 48], sizes = [16, 16], strides = [1, 1]} : vector<16x64xbf16> to vector<16x16xbf16>
    %25 = arith.extf %24 : vector<16x16xbf16> to vector<16x16xf32>
    %cst_17 = arith.constant 5.000000e-01 : f32
    %26 = vector.broadcast %cst_17 : f32 to vector<16x16xf32>
    %27 = arith.mulf %26, %23 : vector<16x16xf32>
    %28 = math.exp %27 : vector<16x16xf32>
    %29 = arith.mulf %25, %28 : vector<16x16xf32>
    %30 = arith.addf %22, %29 : vector<16x16xf32>
    %31 = arith.truncf %30 : vector<16x16xf32> to vector<16x16xbf16>
    %c0_18 = arith.constant 0 : index
    %c0_19 = arith.constant 0 : index
    %32 = vector.load %arg8[%c0_18, %c0_19] : memref<16x256xbf16, #tpu.memory_space<vmem>>, vector<16x256xbf16>
    %cst_20 = arith.constant dense<0.000000e+00> : vector<16x256xf32>
    %33 = tpu.matmul %31, %32, %cst_20 {dimension_numbers = #tpu.dot_dimension_numbers<[1], [0], [0], [1], [0, 0, 1, 1], [], []>} : vector<16x16xbf16>, vector<16x256xbf16>, vector<16x256xf32> -> vector<16x256xf32>
    %c0_21 = arith.constant 0 : index
    %c0_22 = arith.constant 0 : index
    %34 = vector.load %arg9[%c0_21, %c0_22] : memref<1x256xf32, #tpu.memory_space<vmem>>, vector<1x256xf32>
    %35 = vector.broadcast %34 : vector<1x256xf32> to vector<16x256xf32>
    %36 = arith.addf %33, %35 : vector<16x256xf32>
    %cst_23 = arith.constant 0.000000e+00 : f32
    %37 = vector.broadcast %cst_23 : f32 to vector<16x256xf32>
    %38 = arith.maximumf %36, %37 : vector<16x256xf32>
    %39 = arith.truncf %38 : vector<16x256xf32> to vector<16x256xbf16>
    %c0_24 = arith.constant 0 : index
    %c0_25 = arith.constant 0 : index
    %40 = vector.load %arg10[%c0_24, %c0_25] : memref<256x512xbf16, #tpu.memory_space<vmem>>, vector<256x512xbf16>
    %cst_26 = arith.constant dense<0.000000e+00> : vector<16x512xf32>
    %41 = tpu.matmul %39, %40, %cst_26 {dimension_numbers = #tpu.dot_dimension_numbers<[1], [0], [0], [1], [0, 0, 1, 1], [], []>} : vector<16x256xbf16>, vector<256x512xbf16>, vector<16x512xf32> -> vector<16x512xf32>
    %c0_27 = arith.constant 0 : index
    %c0_28 = arith.constant 0 : index
    %42 = vector.load %arg11[%c0_27, %c0_28] : memref<1x512xf32, #tpu.memory_space<vmem>>, vector<1x512xf32>
    %43 = vector.broadcast %42 : vector<1x512xf32> to vector<16x512xf32>
    %44 = arith.addf %41, %43 : vector<16x512xf32>
    %cst_29 = arith.constant 0.000000e+00 : f32
    %45 = vector.broadcast %cst_29 : f32 to vector<16x512xf32>
    %46 = arith.maximumf %44, %45 : vector<16x512xf32>
    %47 = arith.truncf %46 : vector<16x512xf32> to vector<16x512xbf16>
    %c0_30 = arith.constant 0 : index
    %c0_31 = arith.constant 0 : index
    %48 = vector.load %arg12[%c0_30, %c0_31] : memref<512x16xbf16, #tpu.memory_space<vmem>>, vector<512x16xbf16>
    %cst_32 = arith.constant dense<0.000000e+00> : vector<16x16xf32>
    %49 = tpu.matmul %47, %48, %cst_32 {dimension_numbers = #tpu.dot_dimension_numbers<[1], [0], [0], [1], [0, 0, 1, 1], [], []>} : vector<16x512xbf16>, vector<512x16xbf16>, vector<16x16xf32> -> vector<16x16xf32>
    %c0_33 = arith.constant 0 : index
    %c0_34 = arith.constant 0 : index
    %50 = vector.load %arg13[%c0_33, %c0_34] : memref<1x16xf32, #tpu.memory_space<vmem>>, vector<1x16xf32>
    %51 = vector.broadcast %50 : vector<1x16xf32> to vector<16x16xf32>
    %52 = arith.addf %49, %51 : vector<16x16xf32>
    %53 = arith.negf %52 : vector<16x16xf32>
    %54 = math.exp %53 : vector<16x16xf32>
    %cst_35 = arith.constant 1.000000e+00 : f32
    %55 = vector.broadcast %cst_35 : f32 to vector<16x16xf32>
    %56 = arith.addf %55, %54 : vector<16x16xf32>
    %57 = arith.divf %55, %56 : vector<16x16xf32>
    %58 = tpu.concatenate %57, %22, %23 in 1 : vector<16x16xf32>, vector<16x16xf32>, vector<16x16xf32> -> vector<16x48xf32>
    %c0_36 = arith.constant 0 : index
    %c0_37 = arith.constant 0 : index
    %59 = vector.load %arg14[%c0_36, %c0_37] : memref<16x48xf32, #tpu.memory_space<vmem>>, vector<16x48xf32>
    tpu.vector_store %arg14[%c0_36, %c0_37], %58 {strides = array<i32>} : memref<16x48xf32, #tpu.memory_space<vmem>>, vector<16x48xf32>,
    return
  }
  func.func @transform_0(%arg0: i32) -> (i32, i32) {
    %c0_i32 = arith.constant 0 : i32
    %c0_i32_0 = arith.constant 0 : i32
    return %arg0, %c0_i32 : i32, i32
  }
  func.func @transform_1(%arg0: i32) -> (i32, i32) {
    %c0_i32 = arith.constant 0 : i32
    %c0_i32_0 = arith.constant 0 : i32
    %c0_i32_1 = arith.constant 0 : i32
    return %c0_i32, %c0_i32_0 : i32, i32
  }
  func.func @transform_2(%arg0: i32) -> (i32, i32) {
    %c0_i32 = arith.constant 0 : i32
    %c0_i32_0 = arith.constant 0 : i32
    %c0_i32_1 = arith.constant 0 : i32
    return %c0_i32, %c0_i32_0 : i32, i32
  }
  func.func @transform_3(%arg0: i32) -> (i32, i32) {
    %c0_i32 = arith.constant 0 : i32
    %c0_i32_0 = arith.constant 0 : i32
    %c0_i32_1 = arith.constant 0 : i32
    return %c0_i32, %c0_i32_0 : i32, i32
  }
  func.func @transform_4(%arg0: i32) -> (i32, i32) {
    %c0_i32 = arith.constant 0 : i32
    %c0_i32_0 = arith.constant 0 : i32
    %c0_i32_1 = arith.constant 0 : i32
    return %c0_i32, %c0_i32_0 : i32, i32
  }
  func.func @transform_5(%arg0: i32) -> (i32, i32) {
    %c0_i32 = arith.constant 0 : i32
    %c0_i32_0 = arith.constant 0 : i32
    %c0_i32_1 = arith.constant 0 : i32
    return %c0_i32, %c0_i32_0 : i32, i32
  }
  func.func @transform_6(%arg0: i32) -> (i32, i32) {
    %c0_i32 = arith.constant 0 : i32
    %c0_i32_0 = arith.constant 0 : i32
    %c0_i32_1 = arith.constant 0 : i32
    return %c0_i32, %c0_i32_0 : i32, i32
  }
  func.func @transform_7(%arg0: i32) -> (i32, i32) {
    %c0_i32 = arith.constant 0 : i32
    %c0_i32_0 = arith.constant 0 : i32
    %c0_i32_1 = arith.constant 0 : i32
    return %c0_i32, %c0_i32_0 : i32, i32
  }
  func.func @transform_8(%arg0: i32) -> (i32, i32) {
    %c0_i32 = arith.constant 0 : i32
    %c0_i32_0 = arith.constant 0 : i32
    %c0_i32_1 = arith.constant 0 : i32
    return %c0_i32, %c0_i32_0 : i32, i32
  }
  func.func @transform_9(%arg0: i32) -> (i32, i32) {
    %c0_i32 = arith.constant 0 : i32
    %c0_i32_0 = arith.constant 0 : i32
    %c0_i32_1 = arith.constant 0 : i32
    return %c0_i32, %c0_i32_0 : i32, i32
  }
  func.func @transform_10(%arg0: i32) -> (i32, i32) {
    %c0_i32 = arith.constant 0 : i32
    %c0_i32_0 = arith.constant 0 : i32
    %c0_i32_1 = arith.constant 0 : i32
    return %c0_i32, %c0_i32_0 : i32, i32
  }
  func.func @transform_11(%arg0: i32) -> (i32, i32) {
    %c0_i32 = arith.constant 0 : i32
    %c0_i32_0 = arith.constant 0 : i32
    %c0_i32_1 = arith.constant 0 : i32
    return %c0_i32, %c0_i32_0 : i32, i32
  }
  func.func @transform_12(%arg0: i32) -> (i32, i32) {
    %c0_i32 = arith.constant 0 : i32
    %c0_i32_0 = arith.constant 0 : i32
    %c0_i32_1 = arith.constant 0 : i32
    return %c0_i32, %c0_i32_0 : i32, i32
  }
  func.func @transform_13(%arg0: i32) -> (i32, i32) {
    %c0_i32 = arith.constant 0 : i32
    %c0_i32_0 = arith.constant 0 : i32
    return %arg0, %c0_i32 : i32, i32
  }
}

</mosaic_0001>

<bundles_post_ra>
// kernel: tpu_custom_call.1
= control target key start
LH: loop header
LB: loop body
LE: loop exit
PB: predicated region body
PF: predicated region fallthrough
CT: control target
= control target key end

     0   :  { %18 = vsyncpa [#allocation3], 0  ;;  %s3403_s0 = inlined_call_operand.vmem [shape: bf16[16,64], index: 0, kind: input, shape index: {}]   ;;  %s3404_s1 = inlined_call_operand.vmem [shape: bf16[64,512], index: 1, kind: input, shape index: {}]   ;;  %s3405_s2 = inlined_call_operand.vmem [shape: f32[1,512], index: 2, kind: input, shape index: {}]   ;;  %s3406_s3 = inlined_call_operand.hbm [shape: bf16[512,256], index: 3, kind: input, shape index: {}]   ;;  %s3407_s4 = inlined_call_operand.vmem [shape: f32[1,256], index: 4, kind: input, shape index: {}]   ;;  %s3408_s5 = inlined_call_operand.vmem [shape: bf16[256,32], index: 5, kind: input, shape index: {}]   ;;  %s3409_s6 = inlined_call_operand.vmem [shape: f32[1,32], index: 6, kind: input, shape index: {}]   ;;  %s3410_s7 = inlined_call_operand.vmem [shape: bf16[16,256], index: 7, kind: input, shape index: {}]   ;;  %s3411_s8 = inlined_call_operand.vmem [shape: f32[1,256], index: 8, kind: input, shape index: {}]   ;;  %s3412_s9 = inlined_call_operand.hbm [shape: bf16[256,512], index: 9, kind: input, shape index: {}]   ;;  %s3413_s10 = inlined_call_operand.vmem [shape: f32[1,512], index: 10, kind: input, shape index: {}]   ;;  %s3414_s11 = inlined_call_operand.vmem [shape: bf16[512,16], index: 11, kind: input, shape index: {}]   ;;  %s3415_s12 = inlined_call_operand.vmem [shape: f32[1,16], index: 12, kind: input, shape index: {}]   ;;  %s3416_s13 = inlined_call_operand.hbm [shape: f32[16,48], index: 13, kind: output, shape index: {}]  }
   0x1   :  { %19 = vsyncpa [#allocation6], 0 }
   0x2   :  { %20 = vsyncpa [#allocation4], 0  ;;  %s31_s27 = sshll.u32 %s3406_s3, 4  ;;  %s3008_s28 = smov [#allocation2]   ;;  %s32_s27 = int_to_ptr.hbm [resolvable:$true] %s31_s27 }
   0x3   :  { %s33_s29 = sshll.u32 %s3008_s28, 4  ;;  %s54_s15 = sshll.u32 %s3412_s9, 4  ;;  %s34_s29 = int_to_ptr.vmem [resolvable:$true] %s33_s29  ;;  %s55_s15 = int_to_ptr.hbm [resolvable:$true] %s54_s15 }
   0x4   :  { %s3009_s16 = smov 128   ;;  %s3010_s17 = smov 8  }
   0x5   :  { %39 = dma.hbm_to_vmem [thread:$0]  %s32_s27, 8192, %s34_s29, [#allocation3], %s3009_s16, %s3009_s16, %s3010_s17  }
   0x6   :  { %s3011_s18 = smov [#allocation5]   ;;  %s3012_s20 = smov 256  }
   0x7   :  { %s56_s19 = sshll.u32 %s3011_s18, 4  ;;  %s3013_s3 = smov 16   ;;  %s57_s19 = int_to_ptr.vmem [resolvable:$true] %s56_s19 }
   0x8   :  { %62 = dma.hbm_to_vmem [thread:$0]  %s55_s15, 8192, %s57_s19, [#allocation6], %s3012_s20, %s3012_s20, %s3013_s3  }
   0x9   :  { %3002 = dma.done.wait [#allocation3], 8192  }
   0xa   :  { %3003 = vsyncadd [#allocation3], 4294959104 }
   0xb   :  { %3004 = dma.done.wait [#allocation6], 8192  }
   0xc   :  { %3005 = vsyncadd [#allocation6], 4294959104  ;;  %v1978_v0 = vld [vmem:[%s3404_s1 + $0x60] sm:$0xf]  ;;  %v2727_v1 = vld [vmem:[%s3404_s1 + $0x6c] sm:$0xf0] }
   0xd   :  { %v2725_v2 = vld [vmem:[%s3404_s1 + $0x64] sm:$0xf]  ;;  %v1979_v3 = vor.u32 %v2727_v1, %v1978_v0  ;;  %v1980_v4 = vld [vmem:[%s3404_s1 + $0x70] sm:$0xf0]  ;;  %v1986_v5 = vld [vmem:[%s3404_s1 + $0x68] sm:$0xf] }
   0xe   :  { %v2728_v6 = vld [vmem:[%s3404_s1 + $0x74] sm:$0xf0]  ;;  %v1983_v7 = vor.u32 %v2725_v2, %v1980_v4  ;;  %v2726_v9 = vld [vmem:[%s3404_s1 + $0x6c] sm:$0xf]  ;;  %v1988_v10 = vld [vmem:[%s3404_s1 + $0x78] sm:$0xf0] }
   0xf   :  { %v1987_v8 = vor.u32 %v2728_v6, %v1986_v5  ;;  %v1962_v11 = vld [vmem:[%s3404_s1 + $0x40] sm:$0xf]  ;;  %199 = vmatpush.bf16.msra.mxu0 %v1979_v3  ;;  %v1991_v12 = vor.u32 %v2726_v9, %v1988_v10  ;;  %v2723_v13 = vld [vmem:[%s3404_s1 + $0x4c] sm:$0xf0]  ;;  %v2721_v14 = vld [vmem:[%s3404_s1 + $0x44] sm:$0xf] }
  0x10   :  { %v1964_v15 = vld [vmem:[%s3404_s1 + $0x50] sm:$0xf0]  ;;  %213 = vmatpush.bf16.msra.mxu1 %v1983_v7  ;;  %v1963_v16 = vor.u32 %v2723_v13, %v1962_v11  ;;  %v1970_v18 = vld [vmem:[%s3404_s1 + $0x48] sm:$0xf]  ;;  %v2724_v19 = vld [vmem:[%s3404_s1 + $0x54] sm:$0xf0] }
  0x11   :  { %227 = vmatpush.bf16.msra.mxu2 %v1987_v8  ;;  %v1967_v17 = vor.u32 %v2721_v14, %v1964_v15  ;;  %v2722_v20 = vld [vmem:[%s3404_s1 + $0x4c] sm:$0xf]  ;;  %241 = vmatpush.bf16.msra.mxu3 %v1991_v12  ;;  %v1971_v21 = vor.u32 %v2724_v19, %v1970_v18  ;;  %v1972_v22 = vld [vmem:[%s3404_s1 + $0x58] sm:$0xf0]  ;;  %v1946_v23 = vld [vmem:[%s3404_s1 + $0x20] sm:$0xf] }
  0x12   :  { %v2719_v24 = vld [vmem:[%s3404_s1 + $0x2c] sm:$0xf0]  ;;  %v1975_v25 = vor.u32 %v2722_v20, %v1972_v22  ;;  %v2717_v26 = vld [vmem:[%s3404_s1 + $0x24] sm:$0xf]  ;;  %v1948_v27 = vld [vmem:[%s3404_s1 + $0x30] sm:$0xf0] }
  0x13   :  { %v1954_v28 = vld [vmem:[%s3404_s1 + $0x28] sm:$0xf]  ;;  %200 = vmatpush.bf16.msra.mxu0 %v1963_v16  ;;  %v1947_v29 = vor.u32 %v2719_v24, %v1946_v23  ;;  %v2720_v30 = vld [vmem:[%s3404_s1 + $0x34] sm:$0xf0]  ;;  %v2718_v31 = vld [vmem:[%s3404_s1 + $0x2c] sm:$0xf]  ;;  %v1951_v33 = vor.u32 %v2717_v26, %v1948_v27 }
  0x14   :  { %v1956_v32 = vld [vmem:[%s3404_s1 + $0x38] sm:$0xf0]  ;;  %214 = vmatpush.bf16.msra.mxu1 %v1967_v17  ;;  %v1955_v34 = vor.u32 %v2720_v30, %v1954_v28  ;;  %v1930_v35 = vld [vmem:[%s3404_s1] sm:$0xf]  ;;  %v2715_v36 = vld [vmem:[%s3404_s1 + $0xc] sm:$0xf0] }
  0x15   :  { %228 = vmatpush.bf16.msra.mxu2 %v1971_v21  ;;  %v2713_v37 = vld [vmem:[%s3404_s1 + $0x4] sm:$0xf]  ;;  %242 = vmatpush.bf16.msra.mxu3 %v1975_v25  ;;  %v1959_v38 = vor.u32 %v2718_v31, %v1956_v32  ;;  %v1932_v39 = vld [vmem:[%s3404_s1 + $0x10] sm:$0xf0]  ;;  %v1938_v40 = vld [vmem:[%s3404_s1 + $0x8] sm:$0xf]  ;;  %v1931_v44 = vor.u32 %v2715_v36, %v1930_v35 }
  0x16   :  { %v2716_v41 = vld [vmem:[%s3404_s1 + $0x14] sm:$0xf0]  ;;  %v2714_v42 = vld [vmem:[%s3404_s1 + $0xc] sm:$0xf]  ;;  %v1940_v43 = vld [vmem:[%s3404_s1 + $0x18] sm:$0xf0]  ;;  %v1935_v48 = vor.u32 %v2713_v37, %v1932_v39 }
  0x17   :  { %201 = vmatpush.bf16.msra.mxu0 %v1947_v29  ;;  %v2054_v45 = vld [vmem:[#allocation2 + $0x70] sm:$0xf]  ;;  %v2744_v46 = vld [vmem:[#allocation2 + $0x74] sm:$0xf0]  ;;  %v1939_v49 = vor.u32 %v2716_v41, %v1938_v40  ;;  %v2712_v50 = vld [vmem:[%s3403_s0] sm:$0xff]  ;;  %v1943_v52 = vor.u32 %v2714_v42, %v1940_v43  ;;  %vm191_vm0 = vcmask 523264  }
  0x18   :  { %v2118_v47 = vld [vmem:[#allocation2 + $0xf0] sm:$0xf]  ;;  %215 = vmatpush.bf16.msra.mxu1 %v1951_v33  ;;  %v2760_v51 = vld [vmem:[#allocation2 + $0xf4] sm:$0xf0]  ;;  %v2055_v53 = vor.u32 %v2744_v46, %v2054_v45  ;;  %v2046_v54 = vld [vmem:[#allocation2 + $0x60] sm:$0xf] }
  0x19   :  { %229 = vmatpush.bf16.msra.mxu2 %v1955_v34  ;;  %243 = vmatpush.bf16.msra.mxu3 %v1959_v38  ;;  %v2742_v55 = vld [vmem:[#allocation2 + $0x64] sm:$0xf0]  ;;  %v2182_v56 = vld [vmem:[#allocation2 + $0x170] sm:$0xf]  ;;  %v2119_v57 = vor.u32 %v2760_v51, %v2118_v47  ;;  %v2776_v58 = vld [vmem:[#allocation2 + $0x174] sm:$0xf0] }
  0x1a   :  { %v2246_v59 = vld [vmem:[#allocation2 + $0x1f0] sm:$0xf]  ;;  %v2792_v60 = vld [vmem:[#allocation2 + $0x1f4] sm:$0xf0]  ;;  %v2110_v61 = vld [vmem:[#allocation2 + $0xe0] sm:$0xf]  ;;  %v2183_v63 = vor.u32 %v2776_v58, %v2182_v56  ;;  %v2047_v0 = vor.u32 %v2742_v55, %v2046_v54 }
  0x1b   :  { %202 = vmatpush.bf16.msra.mxu0 %v1931_v44  ;;  %v2758_v62 = vld [vmem:[#allocation2 + $0xe4] sm:$0xf0]  ;;  %v2247_v1 = vor.u32 %v2792_v60, %v2246_v59  ;;  %v2038_v2 = vld [vmem:[#allocation2 + $0x50] sm:$0xf]  ;;  %v2174_v3 = vld [vmem:[#allocation2 + $0x160] sm:$0xf] }
  0x1c   :  { %216 = vmatpush.bf16.msra.mxu1 %v1935_v48  ;;  %v2774_v4 = vld [vmem:[#allocation2 + $0x164] sm:$0xf0]  ;;  %v2111_v5 = vor.u32 %v2758_v62, %v2110_v61  ;;  %v2740_v6 = vld [vmem:[#allocation2 + $0x54] sm:$0xf0]  ;;  %v2238_v7 = vld [vmem:[#allocation2 + $0x1e0] sm:$0xf] }
  0x1d   :  { %230 = vmatpush.bf16.msra.mxu2 %v1939_v49  ;;  %244 = vmatpush.bf16.msra.mxu3 %v1943_v52  ;;  %v2790_v8 = vld [vmem:[#allocation2 + $0x1e4] sm:$0xf0]  ;;  %v2102_v9 = vld [vmem:[#allocation2 + $0xd0] sm:$0xf]  ;;  %v2756_v10 = vld [vmem:[#allocation2 + $0xd4] sm:$0xf0]  ;;  %v2175_v11 = vor.u32 %v2774_v4, %v2174_v3  ;;  %v2039_v12 = vor.u32 %v2740_v6, %v2038_v2 }
  0x1e   :  { %1992 = vmatmul.msk.bf16.vlgmr.msra.gmra.mxu0 %vm191_vm0, %v2712_v50  ;;  %v2239_v13 = vor.u32 %v2790_v8, %v2238_v7  ;;  %v2030_v14 = vld [vmem:[#allocation2 + $0x40] sm:$0xf]  ;;  %v2166_v15 = vld [vmem:[#allocation2 + $0x150] sm:$0xf]  ;;  %v2772_v16 = vld [vmem:[#allocation2 + $0x154] sm:$0xf0]  ;;  %v2103_v17 = vor.u32 %v2756_v10, %v2102_v9 }
  0x1f   :  { %653 = vmatpush.bf16.msrb.mxu0 %v2055_v53  ;;  %1993 = vmatmul.msk.bf16.vlgmr.msra.gmra.mxu1 %vm191_vm0, %v2712_v50  ;;  %v2738_v18 = vld [vmem:[#allocation2 + $0x44] sm:$0xf0]  ;;  %v2230_v19 = vld [vmem:[#allocation2 + $0x1d0] sm:$0xf]  ;;  %v2788_v20 = vld [vmem:[#allocation2 + $0x1d4] sm:$0xf0]  ;;  %v2167_v23 = vor.u32 %v2772_v16, %v2166_v15 }
  0x20   :  { %667 = vmatpush.bf16.msrb.mxu1 %v2119_v57  ;;  %1994 = vmatmul.msk.bf16.vlgmr.msra.gmra.mxu2 %vm191_vm0, %v2712_v50  ;;  %v2094_v21 = vld [vmem:[#allocation2 + $0xc0] sm:$0xf]  ;;  %v2754_v22 = vld [vmem:[#allocation2 + $0xc4] sm:$0xf0]  ;;  %v2031_v24 = vor.u32 %v2738_v18, %v2030_v14  ;;  %v2231_v25 = vor.u32 %v2788_v20, %v2230_v19  ;;  %v2022_v26 = vld [vmem:[#allocation2 + $0x30] sm:$0xf] }
  0x21   :  { %1995 = vmatmul.msk.bf16.vlgmr.msra.gmra.mxu3 %vm191_vm0, %v2712_v50  ;;  %681 = vmatpush.bf16.msrb.mxu2 %v2183_v63  ;;  %v2158_v27 = vld [vmem:[#allocation2 + $0x140] sm:$0xf]  ;;  %v2770_v28 = vld [vmem:[#allocation2 + $0x144] sm:$0xf0]  ;;  %v2095_v29 = vor.u32 %v2754_v22, %v2094_v21  ;;  %v2736_v30 = vld [vmem:[#allocation2 + $0x34] sm:$0xf0] }
  0x22   :  { %695 = vmatpush.bf16.msrb.mxu3 %v2247_v1  ;;  %v2222_v31 = vld [vmem:[#allocation2 + $0x1c0] sm:$0xf]  ;;  %v2786_v32 = vld [vmem:[#allocation2 + $0x1c4] sm:$0xf0]  ;;  %v2086_v33 = vld [vmem:[#allocation2 + $0xb0] sm:$0xf]  ;;  %v2159_v35 = vor.u32 %v2770_v28, %v2158_v27  ;;  %v2023_v38 = vor.u32 %v2736_v30, %v2022_v26 }
  0x23   :  { %654 = vmatpush.bf16.msrb.mxu0 %v2047_v0  ;;  %v2752_v34 = vld [vmem:[#allocation2 + $0xb4] sm:$0xf0]  ;;  %v2014_v36 = vld [vmem:[#allocation2 + $0x20] sm:$0xf]  ;;  %v2734_v37 = vld [vmem:[#allocation2 + $0x24] sm:$0xf0]  ;;  %v2223_v39 = vor.u32 %v2786_v32, %v2222_v31 }
  0x24   :  { %668 = vmatpush.bf16.msrb.mxu1 %v2111_v5  ;;  %v2150_v40 = vld [vmem:[#allocation2 + $0x130] sm:$0xf]  ;;  %v2768_v41 = vld [vmem:[#allocation2 + $0x134] sm:$0xf0]  ;;  %v2087_v43 = vor.u32 %v2752_v34, %v2086_v33  ;;  %v2078_v45 = vld [vmem:[#allocation2 + $0xa0] sm:$0xf]  ;;  %v2015_v48 = vor.u32 %v2734_v37, %v2014_v36 }
  0x25   :  { %682 = vmatpush.bf16.msrb.mxu2 %v2175_v11  ;;  %v2214_v42 = vld [vmem:[#allocation2 + $0x1b0] sm:$0xf]  ;;  %v2784_v44 = vld [vmem:[#allocation2 + $0x1b4] sm:$0xf0]  ;;  %v2750_v46 = vld [vmem:[#allocation2 + $0xa4] sm:$0xf0]  ;;  %v2151_v47 = vor.u32 %v2768_v41, %v2150_v40 }
  0x26   :  { %696 = vmatpush.bf16.msrb.mxu3 %v2239_v13  ;;  %v2215_v49 = vor.u32 %v2784_v44, %v2214_v42  ;;  %v2006_v50 = vld [vmem:[#allocation2 + $0x10] sm:$0xf]  ;;  %v2142_v51 = vld [vmem:[#allocation2 + $0x120] sm:$0xf]  ;;  %v2766_v52 = vld [vmem:[#allocation2 + $0x124] sm:$0xf0]  ;;  %v2079_v53 = vor.u32 %v2750_v46, %v2078_v45 }
  0x27   :  { %655 = vmatpush.bf16.msrb.mxu0 %v2039_v12  ;;  %v2732_v54 = vld [vmem:[#allocation2 + $0x14] sm:$0xf0]  ;;  %v2206_v55 = vld [vmem:[#allocation2 + $0x1a0] sm:$0xf]  ;;  %v2782_v56 = vld [vmem:[#allocation2 + $0x1a4] sm:$0xf0]  ;;  %v2143_v59 = vor.u32 %v2766_v52, %v2142_v51 }
  0x28   :  { %669 = vmatpush.bf16.msrb.mxu1 %v2103_v17  ;;  %v2070_v57 = vld [vmem:[#allocation2 + $0x90] sm:$0xf]  ;;  %v2748_v58 = vld [vmem:[#allocation2 + $0x94] sm:$0xf0]  ;;  %v2007_v60 = vor.u32 %v2732_v54, %v2006_v50  ;;  %v2207_v61 = vor.u32 %v2782_v56, %v2206_v55  ;;  %v1998_v63 = vld [vmem:[#allocation2] sm:$0xf] }
  0x29   :  { %683 = vmatpush.bf16.msrb.mxu2 %v2167_v23  ;;  %v2071_v62 = vor.u32 %v2748_v58, %v2070_v57  ;;  %v2730_v0 = vld [vmem:[#allocation2 + $0x4] sm:$0xf0]  ;;  %v2062_v1 = vld [vmem:[#allocation2 + $0x80] sm:$0xf]  ;;  %v2743_v5 = vld [vmem:[#allocation2 + $0x74] sm:$0xf] }
  0x2a   :  { %697 = vmatpush.bf16.msrb.mxu3 %v2231_v25  ;;  %v2746_v2 = vld [vmem:[#allocation2 + $0x84] sm:$0xf0]  ;;  %v1999_v3 = vor.u32 %v2730_v0, %v1998_v63  ;;  %v2056_v6 = vld [vmem:[#allocation2 + $0x78] sm:$0xf0]  ;;  %v2759_v7 = vld [vmem:[#allocation2 + $0xf4] sm:$0xf] }
  0x2b   :  { %656 = vmatpush.bf16.msrb.mxu0 %v2031_v24  ;;  %v2063_v4 = vor.u32 %v2746_v2, %v2062_v1  ;;  %v2059_v8 = vor.u32 %v2743_v5, %v2056_v6  ;;  %v2120_v9 = vld [vmem:[#allocation2 + $0xf8] sm:$0xf0]  ;;  %v2134_v10 = vld [vmem:[#allocation2 + $0x110] sm:$0xf]  ;;  %v2764_v11 = vld [vmem:[#allocation2 + $0x114] sm:$0xf0] }
  0x2c   :  { %670 = vmatpush.bf16.msrb.mxu1 %v2095_v29  ;;  %v2123_v12 = vor.u32 %v2759_v7, %v2120_v9  ;;  %v2135_v13 = vor.u32 %v2764_v11, %v2134_v10  ;;  %v2198_v14 = vld [vmem:[#allocation2 + $0x190] sm:$0xf]  ;;  %v2780_v15 = vld [vmem:[#allocation2 + $0x194] sm:$0xf0]  ;;  %v2741_v17 = vld [vmem:[#allocation2 + $0x64] sm:$0xf] }
  0x2d   :  { %684 = vmatpush.bf16.msrb.mxu2 %v2159_v35  ;;  %v2199_v16 = vor.u32 %v2780_v15, %v2198_v14  ;;  %v2048_v18 = vld [vmem:[#allocation2 + $0x68] sm:$0xf0]  ;;  %v2757_v20 = vld [vmem:[#allocation2 + $0xe4] sm:$0xf]  ;;  %v2126_v22 = vld [vmem:[#allocation2 + $0x100] sm:$0xf] }
  0x2e   :  { %698 = vmatpush.bf16.msrb.mxu3 %v2223_v39  ;;  %v2051_v19 = vor.u32 %v2741_v17, %v2048_v18  ;;  %v2112_v21 = vld [vmem:[#allocation2 + $0xe8] sm:$0xf0]  ;;  %v2762_v24 = vld [vmem:[#allocation2 + $0x104] sm:$0xf0]  ;;  %v2190_v25 = vld [vmem:[#allocation2 + $0x180] sm:$0xf] }
  0x2f   :  { %657 = vmatpush.bf16.msrb.mxu0 %v2023_v38  ;;  %v2115_v23 = vor.u32 %v2757_v20, %v2112_v21  ;;  %v2778_v26 = vld [vmem:[#allocation2 + $0x184] sm:$0xf0]  ;;  %v2127_v27 = vor.u32 %v2762_v24, %v2126_v22  ;;  %v2775_v29 = vld [vmem:[#allocation2 + $0x174] sm:$0xf]  ;;  %v2184_v30 = vld [vmem:[#allocation2 + $0x178] sm:$0xf0] }
  0x30   :  { %671 = vmatpush.bf16.msrb.mxu1 %v2087_v43  ;;  %v2191_v28 = vor.u32 %v2778_v26, %v2190_v25  ;;  %v2187_v31 = vor.u32 %v2775_v29, %v2184_v30  ;;  %v2791_v32 = vld [vmem:[#allocation2 + $0x1f4] sm:$0xf]  ;;  %v2248_v33 = vld [vmem:[#allocation2 + $0x1f8] sm:$0xf0]  ;;  %v2773_v41 = vld [vmem:[#allocation2 + $0x164] sm:$0xf] }
  0x31   :  { %685 = vmatpush.bf16.msrb.mxu2 %v2151_v47  ;;  %v2739_v34 = vld [vmem:[#allocation2 + $0x54] sm:$0xf]  ;;  %v2251_v35 = vor.u32 %v2791_v32, %v2248_v33  ;;  %v2040_v36 = vld [vmem:[#allocation2 + $0x58] sm:$0xf0]  ;;  %v2176_v42 = vld [vmem:[#allocation2 + $0x168] sm:$0xf0] }
  0x32   :  { %699 = vmatpush.bf16.msrb.mxu3 %v2215_v49  ;;  %v2755_v37 = vld [vmem:[#allocation2 + $0xd4] sm:$0xf]  ;;  %v2104_v38 = vld [vmem:[#allocation2 + $0xd8] sm:$0xf0]  ;;  %v2043_v39 = vor.u32 %v2739_v34, %v2040_v36  ;;  %v2179_v43 = vor.u32 %v2773_v41, %v2176_v42  ;;  %v2789_v44 = vld [vmem:[#allocation2 + $0x1e4] sm:$0xf] }
  0x33   :  { %658 = vmatpush.bf16.msrb.mxu0 %v2015_v48  ;;  %v2107_v40 = vor.u32 %v2755_v37, %v2104_v38  ;;  %v2240_v45 = vld [vmem:[#allocation2 + $0x1e8] sm:$0xf0]  ;;  %v2737_v47 = vld [vmem:[#allocation2 + $0x44] sm:$0xf]  ;;  %v2168_v54 = vld [vmem:[#allocation2 + $0x158] sm:$0xf0] }
  0x34   :  { %672 = vmatpush.bf16.msrb.mxu1 %v2079_v53  ;;  %v2243_v46 = vor.u32 %v2789_v44, %v2240_v45  ;;  %v2032_v48 = vld [vmem:[#allocation2 + $0x48] sm:$0xf0]  ;;  %v2753_v49 = vld [vmem:[#allocation2 + $0xc4] sm:$0xf]  ;;  %v2771_v53 = vld [vmem:[#allocation2 + $0x154] sm:$0xf] }
  0x35   :  { %686 = vmatpush.bf16.msrb.mxu2 %v2143_v59  ;;  %v2035_v50 = vor.u32 %v2737_v47, %v2032_v48  ;;  %v2096_v51 = vld [vmem:[#allocation2 + $0xc8] sm:$0xf0]  ;;  %v2787_v55 = vld [vmem:[#allocation2 + $0x1d4] sm:$0xf]  ;;  %v2171_v56 = vor.u32 %v2771_v53, %v2168_v54  ;;  %v2232_v57 = vld [vmem:[#allocation2 + $0x1d8] sm:$0xf0] }
  0x36   :  { %700 = vmatpush.bf16.msrb.mxu3 %v2207_v61  ;;  %v2099_v52 = vor.u32 %v2753_v49, %v2096_v51  ;;  %v2235_v58 = vor.u32 %v2787_v55, %v2232_v57  ;;  %v2735_v59 = vld [vmem:[#allocation2 + $0x34] sm:$0xf]  ;;  %v2088_v63 = vld [vmem:[#allocation2 + $0xb8] sm:$0xf0]  ;;  %v2769_v1 = vld [vmem:[#allocation2 + $0x144] sm:$0xf] }
  0x37   :  { %659 = vmatpush.bf16.msrb.mxu0 %v2007_v60  ;;  %v2024_v60 = vld [vmem:[#allocation2 + $0x38] sm:$0xf0]  ;;  %v2751_v61 = vld [vmem:[#allocation2 + $0xb4] sm:$0xf]  ;;  %v2160_v2 = vld [vmem:[#allocation2 + $0x148] sm:$0xf0] }
  0x38   :  { %673 = vmatpush.bf16.msrb.mxu1 %v2071_v62  ;;  %v2027_v62 = vor.u32 %v2735_v59, %v2024_v60  ;;  %v2091_v0 = vor.u32 %v2751_v61, %v2088_v63  ;;  %v2224_v5 = vld [vmem:[#allocation2 + $0x1c8] sm:$0xf0]  ;;  %v2733_v7 = vld [vmem:[#allocation2 + $0x24] sm:$0xf]  ;;  %v2152_v14 = vld [vmem:[#allocation2 + $0x138] sm:$0xf0] }
  0x39   :  { %687 = vmatpush.bf16.msrb.mxu2 %v2135_v13  ;;  %v2749_v9 = vld [vmem:[#allocation2 + $0xa4] sm:$0xf]  ;;  %v2080_v11 = vld [vmem:[#allocation2 + $0xa8] sm:$0xf0]  ;;  %v2767_v13 = vld [vmem:[#allocation2 + $0x134] sm:$0xf] }
  0x3a   :  { %701 = vmatpush.bf16.msrb.mxu3 %v2199_v16  ;;  %v2783_v15 = vld [vmem:[#allocation2 + $0x1b4] sm:$0xf]  ;;  %v2155_v16 = vor.u32 %v2767_v13, %v2152_v14  ;;  %v2216_v17 = vld [vmem:[#allocation2 + $0x1b8] sm:$0xf0]  ;;  %v2765_v24 = vld [vmem:[#allocation2 + $0x124] sm:$0xf] }
  0x3b   :  { %660 = vmatpush.bf16.msrb.mxu0 %v1999_v3  ;;  %v2785_v3 = vld [vmem:[#allocation2 + $0x1c4] sm:$0xf]  ;;  %v2219_v18 = vor.u32 %v2783_v15, %v2216_v17  ;;  %v2008_v20 = vld [vmem:[#allocation2 + $0x18] sm:$0xf0]  ;;  %v2747_v21 = vld [vmem:[#allocation2 + $0x94] sm:$0xf] }
  0x3c   :  { %674 = vmatpush.bf16.msrb.mxu1 %v2063_v4  ;;  %v2163_v4 = vor.u32 %v2769_v1, %v2160_v2  ;;  %v2227_v6 = vor.u32 %v2785_v3, %v2224_v5  ;;  %v2144_v25 = vld [vmem:[#allocation2 + $0x128] sm:$0xf0]  ;;  %v2729_v30 = vld [vmem:[#allocation2 + $0x4] sm:$0xf]  ;;  %v2763_v37 = vld [vmem:[#allocation2 + $0x114] sm:$0xf] }
  0x3d   :  { %688 = vmatpush.bf16.msrb.mxu2 %v2127_v27  ;;  %v2147_v27 = vor.u32 %v2765_v24, %v2144_v25  ;;  %v2208_v29 = vld [vmem:[#allocation2 + $0x1a8] sm:$0xf0]  ;;  %v2745_v33 = vld [vmem:[#allocation2 + $0x84] sm:$0xf]  ;;  %v2136_v38 = vld [vmem:[#allocation2 + $0x118] sm:$0xf0] }
  0x3e   :  { %702 = vmatpush.bf16.msrb.mxu3 %v2191_v28  ;;  %v2781_v28 = vld [vmem:[#allocation2 + $0x1a4] sm:$0xf]  ;;  %v2000_v32 = vld [vmem:[#allocation2 + $0x8] sm:$0xf0]  ;;  %v2139_v41 = vor.u32 %v2763_v37, %v2136_v38  ;;  %v2795_v24 = vld [vmem:[%s3408_s5 + $0x10] sm:$0xff]  ;;  %s3015_s29 = smov 80  }
  0x3f   :  { %709 = vmatpush.bf16.msra.mxu0 %v2059_v8  ;;  %v2016_v8 = vld [vmem:[#allocation2 + $0x28] sm:$0xf0]  ;;  %v2761_v45 = vld [vmem:[#allocation2 + $0x104] sm:$0xf]  ;;  %v2807_v25 = vld [vmem:[%s3408_s5 + $0x70] sm:$0xff]  ;;  %vm978_vm1 = vcmask 130048  }
  0x40   :  { %723 = vmatpush.bf16.msra.mxu1 %v2123_v12  ;;  %v2019_v10 = vor.u32 %v2733_v7, %v2016_v8  ;;  %v2083_v12 = vor.u32 %v2749_v9, %v2080_v11  ;;  %v2064_v34 = vld [vmem:[#allocation2 + $0x88] sm:$0xf0]  ;;  %v2777_v47 = vld [vmem:[#allocation2 + $0x184] sm:$0xf]  ;;  %vm1898_vm6 = vcmask 261120   ;;  %vm1901_vm7 = vcmask 392192  }
  0x41   :  { %737 = vmatpush.bf16.msra.mxu2 %v2187_v31  ;;  %v2211_v31 = vor.u32 %v2781_v28, %v2208_v29  ;;  %v2067_v36 = vor.u32 %v2745_v33, %v2064_v34  ;;  %v2192_v51 = vld [vmem:[#allocation2 + $0x188] sm:$0xf0]  ;;  %v2793_v28 = vld [vmem:[%s3408_s5] sm:$0xff]  ;;  %s1910_s26 = sshll.u32 %s3416_s13, 4  ;;  %s1911_s26 = int_to_ptr.hbm [resolvable:$true] %s1910_s26 }
  0x42   :  { %751 = vmatpush.bf16.msra.mxu3 %v2251_v35  ;;  %v2003_v35 = vor.u32 %v2729_v30, %v2000_v32  ;;  %v2195_v53 = vor.u32 %v2777_v47, %v2192_v51  ;;  %v2805_v29 = vld [vmem:[%s3408_s5 + $0x60] sm:$0xff]  ;;  %v2804_v30 = vld [vmem:[%s3408_s5 + $0x58] sm:$0xff]  ;;  %v2803_v32 = vld [vmem:[%s3408_s5 + $0x50] sm:$0xff] }
  0x43   :  { %710 = vmatpush.bf16.msra.mxu0 %v2051_v19  ;;  %v2731_v19 = vld [vmem:[#allocation2 + $0x14] sm:$0xf]  ;;  %v327_v33 = vld [vmem:[%s3407_s4] sm:$0x3] }
  0x44   :  { %724 = vmatpush.bf16.msra.mxu1 %v2115_v23  ;;  %v2011_v22 = vor.u32 %v2731_v19, %v2008_v20  ;;  %v2072_v23 = vld [vmem:[#allocation2 + $0x98] sm:$0xf0]  ;;  %v2799_v19 = vld [vmem:[%s3408_s5 + $0x30] sm:$0xff]  ;;  %v2798_v20 = vld [vmem:[%s3408_s5 + $0x28] sm:$0xff] }
  0x45   :  { %738 = vmatpush.bf16.msra.mxu2 %v2179_v43  ;;  %v2075_v26 = vor.u32 %v2747_v21, %v2072_v23  ;;  %v96_v43 = vld [vmem:[%s3405_s2] sm:$0xf]  ;;  %v2808_v23 = vld [vmem:[%s3408_s5 + $0x78] sm:$0xff] }
  0x46   :  { %752 = vmatpush.bf16.msra.mxu3 %v2243_v46  ;;  %v2128_v46 = vld [vmem:[#allocation2 + $0x108] sm:$0xf0]  ;;  %v98_v48 = vperm.slane %v96_v43, 0  ;;  %v100_v63 = vperm.slane %v96_v43, 2  ;;  %v101_v1 = vperm.slane %v96_v43, 3  ;;  %v2797_v21 = vld [vmem:[%s3408_s5 + $0x20] sm:$0xff] }
  0x47   :  { %711 = vmatpush.bf16.msra.mxu0 %v2043_v39  ;;  %v2779_v39 = vld [vmem:[#allocation2 + $0x194] sm:$0xf]  ;;  %v2801_v38 = vld [vmem:[%s3408_s5 + $0x40] sm:$0xff] }
  0x48   :  { %725 = vmatpush.bf16.msra.mxu1 %v2107_v40  ;;  %v2200_v40 = vld [vmem:[#allocation2 + $0x198] sm:$0xf0] }
  0x49   :  { %739 = vmatpush.bf16.msra.mxu2 %v2171_v56  ;;  %v2203_v42 = vor.u32 %v2779_v39, %v2200_v40 }
  0x4a   :  { %753 = vmatpush.bf16.msra.mxu3 %v2235_v58 }
  0x4b   :  { %712 = vmatpush.bf16.msra.mxu0 %v2035_v50  ;;  %v2131_v50 = vor.u32 %v2761_v45, %v2128_v46 }
  0x4c   :  { %726 = vmatpush.bf16.msra.mxu1 %v2099_v52  ;;  %v99_v52 = vperm.slane %v96_v43, 1 }
  0x4d   :  { %740 = vmatpush.bf16.msra.mxu2 %v2163_v4  ;;  %v2800_v4 = vld [vmem:[%s3408_s5 + $0x38] sm:$0xff] }
  0x4e   :  { %754 = vmatpush.bf16.msra.mxu3 %v2227_v6 }
  0x4f   :  { %713 = vmatpush.bf16.msra.mxu0 %v2027_v62 }
  0x50   :  { %727 = vmatpush.bf16.msra.mxu1 %v2091_v0 }
  0x51   :  { %741 = vmatpush.bf16.msra.mxu2 %v2155_v16 }
  0x52   :  { %755 = vmatpush.bf16.msra.mxu3 %v2219_v18 }
  0x53   :  { %714 = vmatpush.bf16.msra.mxu0 %v2019_v10 }
  0x54   :  { %728 = vmatpush.bf16.msra.mxu1 %v2083_v12 }
  0x55   :  { %742 = vmatpush.bf16.msra.mxu2 %v2147_v27  ;;  %v2806_v27 = vld [vmem:[%s3408_s5 + $0x68] sm:$0xff] }
  0x56   :  { %756 = vmatpush.bf16.msra.mxu3 %v2211_v31 }
  0x57   :  { %715 = vmatpush.bf16.msra.mxu0 %v2011_v22  ;;  %v2796_v22 = vld [vmem:[%s3408_s5 + $0x18] sm:$0xff] }
  0x58   :  { %729 = vmatpush.bf16.msra.mxu1 %v2075_v26  ;;  %v2794_v26 = vld [vmem:[%s3408_s5 + $0x8] sm:$0xff] }
  0x59   :  { %743 = vmatpush.bf16.msra.mxu2 %v2139_v41 }
  0x5a   :  { %757 = vmatpush.bf16.msra.mxu3 %v2203_v42 }
  0x5b   :  { %716 = vmatpush.bf16.msra.mxu0 %v2003_v35  ;;  %v2802_v35 = vld [vmem:[%s3408_s5 + $0x48] sm:$0xff] }
  0x5c   :  { %730 = vmatpush.bf16.msra.mxu1 %v2067_v36  ;;  %v329_v36 = vperm.slane %v327_v33, 0 }
  0x5d   :  { %744 = vmatpush.bf16.msra.mxu2 %v2131_v50 }
  0x5e   :  { %758 = vmatpush.bf16.msra.mxu3 %v2195_v53 }
  0x9b   :  { %v204_v44 = vpop.f32.mrf.mxu0 }
  0x9c   :  { %v218_v49 = vpop.f32.mrf.mxu1  ;;  %v205_v54 = vadd.f32 %v204_v44, %v98_v48 }
  0x9d   :  { %v219_v55 = vadd.f32 %v218_v49, %v99_v52 }
  0x9e   :  { %v251_v59 = vmax.f32 %v205_v54, 0.0 }
  0x9f   :  { %v252_v62 = vmax.f32 %v219_v55, 0.0 }
  0xa3   :  { %v232_v56 = vpop.f32.mrf.mxu2  ;;  %v206_v58 = vpop.f32.mrf.mxu0 }
  0xa4   :  { %v246_v57 = vpop.f32.mrf.mxu3  ;;  %v207_v60 = vadd.f32 %v206_v58, %v98_v48  ;;  %v220_v61 = vpop.f32.mrf.mxu1  ;;  %v233_v6 = vadd.f32 %v232_v56, %v100_v63 }
  0xa5   :  { %v221_v0 = vadd.f32 %v220_v61, %v99_v52  ;;  %v247_v8 = vadd.f32 %v246_v57, %v101_v1  ;;  %v330_v52 = vperm.slane %v327_v33, 1 }
  0xa6   :  { %v255_v2 = vmax.f32 %v207_v60, 0.0  ;;  %v253_v13 = vmax.f32 %v233_v6, 0.0 }
  0xa7   :  { %v256_v3 = vmax.f32 %v221_v0, 0.0  ;;  %v254_v15 = vmax.f32 %v247_v8, 0.0 }
  0xa8   :  { %v259_v5 = vpack.c.bf16 %v255_v2, %v251_v59 }
  0xa9   :  { %v260_v7 = vpack.c.bf16 %v256_v3, %v252_v62 }
  0xaa   :  { %661 = vmatmul.bf16.vlgmr.msrb.gmra.mxu0 %v259_v5 }
  0xab   :  { %v234_v9 = vpop.f32.mrf.mxu2  ;;  %675 = vmatmul.bf16.vlgmr.msrb.gmra.mxu1 %v260_v7  ;;  %903 = vmatpush.bf16.msrb.mxu0 %v2800_v4 }
  0xac   :  { %v235_v10 = vadd.f32 %v234_v9, %v100_v63  ;;  %v248_v11 = vpop.f32.mrf.mxu3  ;;  %917 = vmatpush.bf16.msrb.mxu1 %v2808_v23 }
  0xad   :  { %v249_v12 = vadd.f32 %v248_v11, %v101_v1 }
  0xae   :  { %v257_v14 = vmax.f32 %v235_v10, 0.0 }
  0xaf   :  { %v258_v16 = vmax.f32 %v249_v12, 0.0  ;;  %904 = vmatpush.bf16.msrb.mxu0 %v2799_v19  ;;  %v2916_v12 = vld [vmem:[%s3409_s6] ss:$0 sm:$0xff]  ;;  %s3014_s6 = smov 32  }
  0xb0   :  { %v261_v17 = vpack.c.bf16 %v257_v14, %v253_v13  ;;  %918 = vmatpush.bf16.msrb.mxu1 %v2807_v25 }
  0xb1   :  { %v262_v18 = vpack.c.bf16 %v258_v16, %v254_v15 }
  0xb2   :  { %689 = vmatmul.bf16.vlgmr.msrb.gmra.mxu2 %v261_v17 }
  0xb3   :  { %703 = vmatmul.bf16.vlgmr.msrb.gmra.mxu3 %v262_v18  ;;  %905 = vmatpush.bf16.msrb.mxu0 %v2798_v20 }
  0xb4   :  { %919 = vmatpush.bf16.msrb.mxu1 %v2806_v27  ;;  %v2810_v27 = vld [vmem:[%s3410_s7 + $0x4] sm:$0xf0] }
  0xb7   :  { %906 = vmatpush.bf16.msrb.mxu0 %v2797_v21 }
  0xb8   :  { %920 = vmatpush.bf16.msrb.mxu1 %v2805_v29 }
  0xba   :  { %717 = vmatmul.bf16.vlgmr.msra.gmra.mxu0 %v259_v5 }
  0xbb   :  { %731 = vmatmul.bf16.vlgmr.msra.gmra.mxu1 %v260_v7  ;;  %907 = vmatpush.bf16.msrb.mxu0 %v2796_v22 }
  0xbc   :  { %921 = vmatpush.bf16.msrb.mxu1 %v2804_v30  ;;  %v2320_v30 = vld [vmem:[%s3410_s7 + $0x8] sm:$0xf0] }
  0xbf   :  { %908 = vmatpush.bf16.msrb.mxu0 %v2795_v24 }
  0xc0   :  { %922 = vmatpush.bf16.msrb.mxu1 %v2803_v32  ;;  %v78_v32 = vld [vmem:[%s3403_s0] sm:$0xff]  }
  0xc1   :  { %v931_v33 = vunpack.c.l.bf16 %v78_v32 }
  0xc2   :  { %745 = vmatmul.bf16.vlgmr.msra.gmra.mxu2 %v261_v17 }
  0xc3   :  { %759 = vmatmul.bf16.vlgmr.msra.gmra.mxu3 %v262_v18  ;;  %909 = vmatpush.bf16.msrb.mxu0 %v2794_v26  ;;  %v2318_v26 = vld [vmem:[%s3410_s7] sm:$0xf] }
  0xc4   :  { %923 = vmatpush.bf16.msrb.mxu1 %v2802_v35  ;;  %v2319_v29 = vor.u32 %v2810_v27, %v2318_v26  ;;  %v2504_v26 = vld [vmem:[#allocation5 + $0x160] sm:$0xf] }
  0xc6   :  { %989 = vmatpush.bf16.msrb.mxu2 %v2319_v29  ;;  %v2823_v29 = vld [vmem:[#allocation5 + $0x64] sm:$0xf] }
  0xc7   :  { %910 = vmatpush.bf16.msrb.mxu0 %v2793_v28  ;;  %v2809_v28 = vld [vmem:[%s3410_s7 + $0x4] sm:$0xf] }
  0xc8   :  { %924 = vmatpush.bf16.msrb.mxu1 %v2801_v38 }
 0x127   :  { %v662_v31 = vpop.f32.mrf.mxu0 }
 0x128   :  { %v676_v34 = vpop.f32.mrf.mxu1  ;;  %v663_v39 = vadd.f32 %v662_v31, %v329_v36  ;;  %v2323_v31 = vor.u32 %v2809_v28, %v2320_v30  ;;  %v2857_v28 = vld [vmem:[#allocation5 + $0x16c] sm:$0xf0]  ;;  %v2378_v30 = vld [vmem:[#allocation5 + $0x70] sm:$0xf0] }
 0x12a   :  { %v677_v43 = vadd.f32 %v676_v34, %v663_v39  ;;  %1003 = vmatpush.bf16.msrb.mxu3 %v2323_v31  ;;  %v2440_v39 = vld [vmem:[#allocation5 + $0xe0] sm:$0xf]  ;;  %v2855_v31 = vld [vmem:[#allocation5 + $0x164] sm:$0xf] }
 0x12f   :  { %v664_v37 = vpop.f32.mrf.mxu0 }
 0x130   :  { %v678_v42 = vpop.f32.mrf.mxu1  ;;  %v665_v44 = vadd.f32 %v664_v37, %v329_v36  ;;  %v932_v36 = vunpack.c.h.bf16 %v78_v32  ;;  %v2506_v32 = vld [vmem:[#allocation5 + $0x170] sm:$0xf0] }
 0x132   :  { %v679_v47 = vadd.f32 %v678_v42, %v665_v44  ;;  %v2839_v44 = vld [vmem:[#allocation5 + $0xe4] sm:$0xf] }
 0x135   :  { %v690_v40 = vpop.f32.mrf.mxu2 }
 0x136   :  { %v704_v41 = vpop.f32.mrf.mxu3  ;;  %v691_v45 = vadd.f32 %v690_v40, %v677_v43  ;;  %v2841_v40 = vld [vmem:[#allocation5 + $0xec] sm:$0xf0] }
 0x137   :  { %v718_v46 = vpop.f32.mrf.mxu0  ;;  %v2441_v42 = vor.u32 %v2841_v40, %v2440_v39  ;;  %v2873_v43 = vld [vmem:[#allocation5 + $0x1ec] sm:$0xf0]  ;;  %v2509_v39 = vor.u32 %v2855_v31, %v2506_v32  ;;  %v2836_v31 = vld [vmem:[#allocation5 + $0xcc] sm:$0xf]  ;;  %v2434_v32 = vld [vmem:[#allocation5 + $0xd8] sm:$0xf0] }
 0x138   :  { %v705_v49 = vadd.f32 %v704_v41, %v691_v45  ;;  %v732_v54 = vpop.f32.mrf.mxu1  ;;  %v719_v57 = vadd.f32 %v718_v46, %v330_v52  ;;  %v2568_v41 = vld [vmem:[#allocation5 + $0x1e0] sm:$0xf]  ;;  %v2442_v45 = vld [vmem:[#allocation5 + $0xf0] sm:$0xf0]  ;;  %v2853_v40 = vld [vmem:[#allocation5 + $0x14c] sm:$0xf0] }
 0x139   :  { %v2569_v46 = vor.u32 %v2873_v43, %v2568_v41  ;;  %1410 = vmatpush.bf16.msra.mxu2 %v2441_v42  ;;  %v2819_v41 = vld [vmem:[#allocation5 + $0x44] sm:$0xf]  ;;  %v2362_v42 = vld [vmem:[#allocation5 + $0x50] sm:$0xf0] }
 0x13a   :  { %v765_v55 = vmax.f32 %v705_v49, 0.0  ;;  %v733_v62 = vadd.f32 %v732_v54, %v719_v57  ;;  %v2570_v49 = vld [vmem:[#allocation5 + $0x1f0] sm:$0xf0]  ;;  %v2869_v54 = vld [vmem:[#allocation5 + $0x1cc] sm:$0xf0] }
 0x13b   :  { %1424 = vmatpush.bf16.msra.mxu3 %v2569_v46  ;;  %v2835_v57 = vld [vmem:[#allocation5 + $0xc4] sm:$0xf] }
 0x13c   :  { %v2851_v43 = vld [vmem:[#allocation5 + $0x144] sm:$0xf] }
 0x13d   :  { %v692_v48 = vpop.f32.mrf.mxu2 }
 0x13e   :  { %v693_v50 = vadd.f32 %v692_v48, %v679_v47  ;;  %v706_v51 = vpop.f32.mrf.mxu3  ;;  %v2445_v47 = vor.u32 %v2839_v44, %v2442_v45  ;;  %v2871_v48 = vld [vmem:[#allocation5 + $0x1e4] sm:$0xf]  ;;  %v2490_v44 = vld [vmem:[#allocation5 + $0x150] sm:$0xf0] }
 0x13f   :  { %v720_v59 = vpop.f32.mrf.mxu0 }
 0x140   :  { %v707_v53 = vadd.f32 %v706_v51, %v693_v50  ;;  %v721_v63 = vadd.f32 %v720_v59, %v330_v52  ;;  %v734_v1 = vpop.f32.mrf.mxu1  ;;  %v2424_v50 = vld [vmem:[#allocation5 + $0xc0] sm:$0xf]  ;;  %v2573_v51 = vor.u32 %v2871_v48, %v2570_v49  ;;  %v2837_v52 = vld [vmem:[#allocation5 + $0xcc] sm:$0xf0]  ;;  %1438 = vmatpush.bf16.msra.mxu0 %v2445_v47  ;;  %v2867_v59 = vld [vmem:[#allocation5 + $0x1c4] sm:$0xf]  ;;  %v2365_v48 = vor.u32 %v2819_v41, %v2362_v42 }
 0x141   :  { %v2344_v49 = vld [vmem:[#allocation5 + $0x20] sm:$0xf]  ;;  %v2866_v42 = vld [vmem:[#allocation5 + $0x1b4] sm:$0xf0] }
 0x142   :  { %v767_v56 = vmax.f32 %v707_v53, 0.0  ;;  %v735_v2 = vadd.f32 %v734_v1, %v721_v63  ;;  %v2552_v53 = vld [vmem:[#allocation5 + $0x1c0] sm:$0xf]  ;;  %1452 = vmatpush.bf16.msra.mxu1 %v2573_v51  ;;  %v2833_v63 = vld [vmem:[#allocation5 + $0xac] sm:$0xf0] }
 0x143   :  { %v2536_v1 = vld [vmem:[#allocation5 + $0x1a0] sm:$0xf] }
 0x144   :  { %v769_v58 = vpack.c.bf16 %v767_v56, %v765_v55  ;;  %v2425_v55 = vor.u32 %v2837_v52, %v2424_v50  ;;  %v2553_v56 = vor.u32 %v2869_v54, %v2552_v53  ;;  %v2817_v50 = vld [vmem:[#allocation5 + $0x2c] sm:$0xf0]  ;;  %v2472_v51 = vld [vmem:[#allocation5 + $0x120] sm:$0xf]  ;;  %v2493_v52 = vor.u32 %v2851_v43, %v2490_v44  ;;  %v2815_v54 = vld [vmem:[#allocation5 + $0x24] sm:$0xf] }
 0x145   :  { %v746_v60 = vpop.f32.mrf.mxu2  ;;  %v2849_v53 = vld [vmem:[#allocation5 + $0x12c] sm:$0xf0]  ;;  %v2832_v43 = vld [vmem:[#allocation5 + $0xac] sm:$0xf]  ;;  %v2418_v44 = vld [vmem:[#allocation5 + $0xb8] sm:$0xf0] }
 0x146   :  { %v760_v61 = vpop.f32.mrf.mxu3  ;;  %911 = vmatmul.bf16.vlgmr.msrb.gmra.mxu0 %v769_v58  ;;  %v747_v0 = vadd.f32 %v746_v60, %v733_v62  ;;  %v2426_v58 = vld [vmem:[#allocation5 + $0xd0] sm:$0xf0]  ;;  %v2408_v62 = vld [vmem:[#allocation5 + $0xa0] sm:$0xf]  ;;  %1411 = vmatpush.bf16.msra.mxu2 %v2425_v55 }
 0x147   :  { %v2429_v60 = vor.u32 %v2835_v57, %v2426_v58  ;;  %1425 = vmatpush.bf16.msra.mxu3 %v2553_v56  ;;  %v2346_v55 = vld [vmem:[#allocation5 + $0x30] sm:$0xf0]  ;;  %v2847_v56 = vld [vmem:[#allocation5 + $0x124] sm:$0xf]  ;;  %v2345_v58 = vor.u32 %v2817_v50, %v2344_v49  ;;  %v2400_v50 = vld [vmem:[#allocation5 + $0x88] sm:$0xf] }
 0x148   :  { %v761_v4 = vadd.f32 %v760_v61, %v747_v0  ;;  %v2554_v61 = vld [vmem:[#allocation5 + $0x1d0] sm:$0xf0] }
 0x149   :  { %v2557_v0 = vor.u32 %v2867_v59, %v2554_v61  ;;  %1439 = vmatpush.bf16.msra.mxu0 %v2429_v60  ;;  %v2474_v57 = vld [vmem:[#allocation5 + $0x130] sm:$0xf0]  ;;  %v2473_v59 = vor.u32 %v2849_v53, %v2472_v51  ;;  %v2349_v60 = vor.u32 %v2815_v54, %v2346_v55  ;;  %v2328_v61 = vld [vmem:[#allocation5] sm:$0xf]  ;;  %v2830_v51 = vld [vmem:[#allocation5 + $0x94] sm:$0xf0] }
 0x14a   :  { %v766_v8 = vmax.f32 %v761_v4, 0.0  ;;  %v2409_v4 = vor.u32 %v2833_v63, %v2408_v62  ;;  %v2813_v62 = vld [vmem:[#allocation5 + $0xc] sm:$0xf0]  ;;  %v2477_v63 = vor.u32 %v2847_v56, %v2474_v57  ;;  %v2401_v53 = vor.u32 %v2830_v51, %v2400_v50  ;;  %v2862_v54 = vld [vmem:[#allocation5 + $0x194] sm:$0xf0] }
 0x14b   :  { %1453 = vmatpush.bf16.msra.mxu1 %v2557_v0  ;;  %v2456_v0 = vld [vmem:[#allocation5 + $0x100] sm:$0xf]  ;;  %v2828_v55 = vld [vmem:[#allocation5 + $0x8c] sm:$0xf]  ;;  %v2402_v56 = vld [vmem:[#allocation5 + $0x98] sm:$0xf0] }
 0x14c   :  { %1412 = vmatpush.bf16.msra.mxu2 %v2409_v4 }
 0x14d   :  { %v748_v3 = vpop.f32.mrf.mxu2 }
 0x14e   :  { %v749_v5 = vadd.f32 %v748_v3, %v735_v2  ;;  %v762_v6 = vpop.f32.mrf.mxu3  ;;  %v2865_v2 = vld [vmem:[#allocation5 + $0x1ac] sm:$0xf0]  ;;  %v2831_v3 = vld [vmem:[#allocation5 + $0xa4] sm:$0xf] }
 0x150   :  { %v763_v7 = vadd.f32 %v762_v6, %v749_v5  ;;  %v2410_v5 = vld [vmem:[#allocation5 + $0xb0] sm:$0xf0]  ;;  %v2863_v6 = vld [vmem:[#allocation5 + $0x1a4] sm:$0xf] }
 0x152   :  { %v768_v9 = vmax.f32 %v763_v7, 0.0  ;;  %v2538_v7 = vld [vmem:[#allocation5 + $0x1b0] sm:$0xf0] }
 0x154   :  { %v770_v10 = vpack.c.bf16 %v768_v9, %v766_v8  ;;  %v2537_v8 = vor.u32 %v2865_v2, %v2536_v1  ;;  %v2413_v9 = vor.u32 %v2831_v3, %v2410_v5  ;;  %v2845_v1 = vld [vmem:[#allocation5 + $0x10c] sm:$0xf0]  ;;  %v2811_v2 = vld [vmem:[#allocation5 + $0x4] sm:$0xf]  ;;  %v2330_v3 = vld [vmem:[#allocation5 + $0x10] sm:$0xf0]  ;;  %v2329_v5 = vor.u32 %v2813_v62, %v2328_v61 }
 0x155   :  { %v2384_v62 = vld [vmem:[#allocation5 + $0x68] sm:$0xf] }
 0x156   :  { %925 = vmatmul.bf16.vlgmr.msrb.gmra.mxu1 %v770_v10  ;;  %v2392_v10 = vld [vmem:[#allocation5 + $0x80] sm:$0xf]  ;;  %1426 = vmatpush.bf16.msra.mxu3 %v2537_v8 }
 0x157   :  { %1440 = vmatpush.bf16.msra.mxu0 %v2413_v9 }
 0x1c3   :  { %v912_v11 = vpop.f32.mrf.mxu0 }
 0x1c4   :  { %v913_v13 = vadd.f32 %v2916_v12, %v912_v11  ;;  %v2829_v11 = vld [vmem:[#allocation5 + $0x8c] sm:$0xf0] }
 0x1cb   :  { %v914_v17 = vpop.f32.mrf.mxu0 }
 0x1cc   :  { %v915_v19 = vadd.f32 %v2916_v12, %v914_v17  ;;  %v2520_v12 = vld [vmem:[#allocation5 + $0x180] sm:$0xf]  ;;  %v2394_v17 = vld [vmem:[#allocation5 + $0x90] sm:$0xf0] }
 0x1d3   :  { %v926_v14 = vpop.f32.mrf.mxu1 }
 0x1d4   :  { %v3257_v15 = vadd.f32 %v926_v14, %v913_v13  ;;  %v2541_v13 = vor.u32 %v2863_v6, %v2538_v7  ;;  %v2861_v14 = vld [vmem:[#allocation5 + $0x18c] sm:$0xf0]  ;;  %v2843_v6 = vld [vmem:[#allocation5 + $0x104] sm:$0xf]  ;;  %v2458_v7 = vld [vmem:[#allocation5 + $0x110] sm:$0xf0] }
 0x1d6   :  { %v933_v16 = vmul.f32 0.5, %v3257_v15  ;;  %1890 = vrot.lane.b32.xlu2 %v3257_v15, %s3013_s3  ;;  %1454 = vmatpush.bf16.msra.mxu1 %v2541_v13  ;;  %v2461_v13 = vor.u32 %v2843_v6, %v2458_v7  ;;  %v2856_v7 = vld [vmem:[#allocation5 + $0x16c] sm:$0xf] }
 0x1d8   :  { %v935_v18 = vmul.f32 1.442695, %v933_v16  ;;  %v2827_v16 = vld [vmem:[#allocation5 + $0x84] sm:$0xf] }
 0x1da   :  { %2918 = vpow2.f32 %v935_v18  ;;  %v2859_v18 = vld [vmem:[#allocation5 + $0x184] sm:$0xf] }
 0x1db   :  { %v928_v20 = vpop.f32.mrf.mxu1 }
 0x1dc   :  { %v3262_v21 = vadd.f32 %v928_v20, %v915_v19  ;;  %v2522_v19 = vld [vmem:[#allocation5 + $0x190] sm:$0xf0]  ;;  %v2393_v20 = vor.u32 %v2829_v11, %v2392_v10  ;;  %v2457_v10 = vor.u32 %v2845_v1, %v2456_v0  ;;  %v2333_v11 = vor.u32 %v2811_v2, %v2330_v3  ;;  %v2512_v0 = vld [vmem:[#allocation5 + $0x168] sm:$0xf]  ;;  %v2858_v2 = vld [vmem:[#allocation5 + $0x174] sm:$0xf0] }
 0x1dd   :  { %v2525_v27 = vor.u32 %v2859_v18, %v2522_v19  ;;  %v2840_v18 = vld [vmem:[#allocation5 + $0xec] sm:$0xf]  ;;  %v2450_v19 = vld [vmem:[#allocation5 + $0xf8] sm:$0xf0] }
 0x1de   :  { %v934_v22 = vmul.f32 0.5, %v3262_v21  ;;  %1892 = vrot.lane.b32.xlu2 %v3262_v21, %s3013_s3  ;;  %1413 = vmatpush.bf16.msra.mxu2 %v2393_v20  ;;  %v2824_v3 = vld [vmem:[#allocation5 + $0x6c] sm:$0xf] }
 0x1df   :  { %1455 = vmatpush.bf16.msra.mxu1 %v2525_v27  ;;  %v2838_v27 = vld [vmem:[#allocation5 + $0xd4] sm:$0xf0] }
 0x1e0   :  { %v2919_v23 = vpop.eup %2918  ;;  %v937_v24 = vmul.f32 1.442695, %v934_v22  ;;  %v2521_v22 = vor.u32 %v2861_v14, %v2520_v12  ;;  %v2448_v14 = vld [vmem:[#allocation5 + $0xe8] sm:$0xf] }
 0x1e1   :  { %941 = vrot.lane.b32.xlu0 %v2919_v23, %s3014_s6  ;;  %v2397_v23 = vor.u32 %v2827_v16, %v2394_v17  ;;  %v2576_v16 = vld [vmem:[#allocation5 + $0x1e8] sm:$0xf]  ;;  %v2874_v17 = vld [vmem:[#allocation5 + $0x1f4] sm:$0xf0] }
 0x1e2   :  { %2920 = vpow2.f32 %v937_v24  ;;  %v2376_v24 = vld [vmem:[#allocation5 + $0x60] sm:$0xf]  ;;  %1427 = vmatpush.bf16.msra.mxu3 %v2521_v22  ;;  %v2577_v20 = vor.u32 %v2874_v17, %v2576_v16  ;;  %v2453_v22 = vor.u32 %v2840_v18, %v2450_v19  ;;  %v2820_v16 = vld [vmem:[#allocation5 + $0x4c] sm:$0xf]  ;;  %v2498_v19 = vld [vmem:[#allocation5 + $0x158] sm:$0xf0] }
 0x1e3   :  { %1441 = vmatpush.bf16.msra.mxu0 %v2397_v23  ;;  %1456 = vmatpush.bf16.msra.mxu1 %v2509_v39  ;;  %v2872_v23 = vld [vmem:[#allocation5 + $0x1ec] sm:$0xf]  ;;  %v2834_v39 = vld [vmem:[#allocation5 + $0xb4] sm:$0xf0] }
 0x1e4   :  { %v2852_v17 = vld [vmem:[#allocation5 + $0x14c] sm:$0xf] }
 0x1e7   :  { %1457 = vmatpush.bf16.msra.mxu1 %v2493_v52  ;;  %v2528_v52 = vld [vmem:[#allocation5 + $0x188] sm:$0xf] }
 0x1e8   :  { %v2921_v25 = vpop.eup %2920  ;;  %v2529_v57 = vor.u32 %v2862_v54, %v2528_v52 }
 0x1e9   :  { %943 = vrot.lane.b32.xlu0 %v2921_v25, %s3014_s6  ;;  %v2825_v25 = vld [vmem:[#allocation5 + $0x6c] sm:$0xf0] }
 0x1eb   :  { %1458 = vmatpush.bf16.msra.mxu1 %v2477_v63  ;;  %v2826_v63 = vld [vmem:[#allocation5 + $0x74] sm:$0xf0] }
 0x1ec   :  { %v2385_v1 = vor.u32 %v2826_v63, %v2384_v62  ;;  %v2890_v63 = vld [vmem:[%s3414_s11 + $0x78] sm:$0xff] }
 0x1ef   :  { %1459 = vmatpush.bf16.msra.mxu1 %v2461_v13  ;;  %v2854_v13 = vld [vmem:[#allocation5 + $0x154] sm:$0xf0] }
 0x253   :  { %v942_v34 = vpop.permute.xlu0 %941 }
 0x254   :  { %v947_v35 = vmul.f32 %v942_v34, %v931_v33  ;;  %v2377_v33 = vor.u32 %v2825_v25, %v2376_v24  ;;  %v2505_v34 = vor.u32 %v2857_v28, %v2504_v26  ;;  %v2578_v24 = vld [vmem:[#allocation5 + $0x1f8] sm:$0xf0]  ;;  %v2432_v26 = vld [vmem:[#allocation5 + $0xc8] sm:$0xf] }
 0x255   :  { %v2581_v25 = vor.u32 %v2872_v23, %v2578_v24  ;;  %v2560_v28 = vld [vmem:[#allocation5 + $0x1c8] sm:$0xf]  ;;  %v2501_v23 = vor.u32 %v2852_v17, %v2498_v19  ;;  %v2903_v17 = vld [vmem:[%s3414_s11 + $0xe0] sm:$0xff] }
 0x256   :  { %951 = vrot.lane.b32.xlu1 %v947_v35, %s3015_s29  ;;  %v2381_v35 = vor.u32 %v2823_v29, %v2378_v30  ;;  %1414 = vmatpush.bf16.msra.mxu2 %v2377_v33  ;;  %v2433_v29 = vor.u32 %v2838_v27, %v2432_v26  ;;  %v2870_v30 = vld [vmem:[#allocation5 + $0x1d4] sm:$0xf0]  ;;  %v2480_v24 = vld [vmem:[#allocation5 + $0x128] sm:$0xf]  ;;  %v2816_v26 = vld [vmem:[#allocation5 + $0x2c] sm:$0xf] }
 0x257   :  { %1428 = vmatpush.bf16.msra.mxu3 %v2505_v34  ;;  %1508 = vmatpush.bf16.msrb.mxu1 %v2581_v25  ;;  %v2561_v33 = vor.u32 %v2870_v30, %v2560_v28  ;;  %v2437_v34 = vor.u32 %v2836_v31, %v2434_v32  ;;  %v2850_v25 = vld [vmem:[#allocation5 + $0x134] sm:$0xf0]  ;;  %v2354_v28 = vld [vmem:[#allocation5 + $0x38] sm:$0xf0]  ;;  %v2896_v19 = vld [vmem:[%s3414_s11 + $0xa8] sm:$0xff] }
 0x258   :  { %1442 = vmatpush.bf16.msra.mxu0 %v2381_v35  ;;  %v2868_v35 = vld [vmem:[#allocation5 + $0x1cc] sm:$0xf]  ;;  %v2482_v30 = vld [vmem:[#allocation5 + $0x138] sm:$0xf0]  ;;  %v2481_v31 = vor.u32 %v2850_v25, %v2480_v24  ;;  %v2357_v32 = vor.u32 %v2816_v26, %v2354_v28  ;;  %v2901_v24 = vld [vmem:[%s3414_s11 + $0xd0] sm:$0xff] }
 0x259   :  { %v2894_v25 = vld [vmem:[%s3414_s11 + $0x98] sm:$0xff]  ;;  %v2900_v26 = vld [vmem:[%s3414_s11 + $0xc8] sm:$0xff]  ;;  %v2899_v28 = vld [vmem:[%s3414_s11 + $0xc0] sm:$0xff] }
 0x25b   :  { %v944_v37 = vpop.permute.xlu0 %943 }
 0x25c   :  { %v948_v38 = vmul.f32 %v944_v37, %v932_v36  ;;  %v2360_v36 = vld [vmem:[#allocation5 + $0x40] sm:$0xf]  ;;  %v2821_v37 = vld [vmem:[#allocation5 + $0x4c] sm:$0xf0]  ;;  %1443 = vmatpush.bf16.msra.mxu0 %v2365_v48  ;;  %v2546_v48 = vld [vmem:[#allocation5 + $0x1b8] sm:$0xf0] }
 0x25d   :  { %v2361_v46 = vor.u32 %v2821_v37, %v2360_v36  ;;  %v2562_v36 = vld [vmem:[#allocation5 + $0x1d8] sm:$0xf0] }
 0x25e   :  { %953 = vrot.lane.b32.xlu1 %v948_v38, %s3015_s29  ;;  %v2488_v38 = vld [vmem:[#allocation5 + $0x140] sm:$0xf]  ;;  %v2565_v37 = vor.u32 %v2868_v35, %v2562_v36  ;;  %v2464_v35 = vld [vmem:[#allocation5 + $0x108] sm:$0xf] }
 0x25f   :  { %v2489_v47 = vor.u32 %v2853_v40, %v2488_v38  ;;  %1415 = vmatpush.bf16.msra.mxu2 %v2361_v46  ;;  %v2416_v38 = vld [vmem:[#allocation5 + $0xa8] sm:$0xf]  ;;  %v2421_v46 = vor.u32 %v2832_v43, %v2418_v44 }
 0x260   :  { %1444 = vmatpush.bf16.msra.mxu0 %v2349_v60  ;;  %v2544_v40 = vld [vmem:[#allocation5 + $0x1a8] sm:$0xf]  ;;  %1509 = vmatpush.bf16.msrb.mxu1 %v2565_v37  ;;  %v2417_v41 = vor.u32 %v2834_v39, %v2416_v38  ;;  %v2530_v60 = vld [vmem:[#allocation5 + $0x198] sm:$0xf0]  ;;  %v2846_v37 = vld [vmem:[#allocation5 + $0x114] sm:$0xf0] }
 0x261   :  { %1429 = vmatpush.bf16.msra.mxu3 %v2489_v47  ;;  %v2864_v47 = vld [vmem:[#allocation5 + $0x1ac] sm:$0xf]  ;;  %v2338_v39 = vld [vmem:[#allocation5 + $0x18] sm:$0xf0]  ;;  %v2465_v43 = vor.u32 %v2846_v37, %v2464_v35 }
 0x262   :  { %v2549_v49 = vor.u32 %v2864_v47, %v2546_v48  ;;  %v2812_v38 = vld [vmem:[#allocation5 + $0xc] sm:$0xf] }
 0x263   :  { %1416 = vmatpush.bf16.msra.mxu2 %v2345_v58  ;;  %v2405_v58 = vor.u32 %v2828_v55, %v2402_v56  ;;  %v2341_v44 = vor.u32 %v2812_v38, %v2338_v39 }
 0x264   :  { %1445 = vmatpush.bf16.msra.mxu0 %v2333_v11  ;;  %1510 = vmatpush.bf16.msrb.mxu1 %v2549_v49  ;;  %v2822_v11 = vld [vmem:[#allocation5 + $0x54] sm:$0xf0] }
 0x265   :  { %1430 = vmatpush.bf16.msra.mxu3 %v2473_v59  ;;  %v2860_v59 = vld [vmem:[#allocation5 + $0x18c] sm:$0xf] }
 0x266   :  { %v2533_v61 = vor.u32 %v2860_v59, %v2530_v60 }
 0x267   :  { %1417 = vmatpush.bf16.msra.mxu2 %v2329_v5  ;;  %v2513_v5 = vor.u32 %v2858_v2, %v2512_v0  ;;  %v2882_v0 = vld [vmem:[%s3414_s11 + $0x38] sm:$0xff]  ;;  %v2881_v2 = vld [vmem:[%s3414_s11 + $0x30] sm:$0xff] }
 0x268   :  { %1494 = vmatpush.bf16.msrb.mxu0 %v2453_v22  ;;  %1511 = vmatpush.bf16.msrb.mxu1 %v2533_v61  ;;  %v2818_v22 = vld [vmem:[#allocation5 + $0x34] sm:$0xf0] }
 0x269   :  { %1431 = vmatpush.bf16.msra.mxu3 %v2457_v10 }
 0x26c   :  { %1495 = vmatpush.bf16.msrb.mxu0 %v2437_v34  ;;  %v2814_v34 = vld [vmem:[#allocation5 + $0x14] sm:$0xf0] }
 0x270   :  { %1496 = vmatpush.bf16.msrb.mxu0 %v2421_v46  ;;  %v962_v46 = vld [vmem:[%s3411_s8] sm:$0x3] }
 0x271   :  { %v964_v49 = vperm.slane %v962_v46, 0  ;;  %v965_v50 = vperm.slane %v962_v46, 1 }
 0x274   :  { %1497 = vmatpush.bf16.msrb.mxu0 %v2405_v58 }
 0x2c8   :  { %v952_v45 = vpop.permute.xlu1 %951 }
 0x2c9   :  { %v957_v8 = vadd.f32 %v952_v45, %v3257_v15  ;;  %v2842_v15 = vld [vmem:[#allocation5 + $0xf4] sm:$0xf0]  ;;  %v2545_v45 = vor.u32 %v2866_v42, %v2544_v40  ;;  %v2844_v40 = vld [vmem:[#allocation5 + $0x10c] sm:$0xf] }
 0x2d0   :  { %v954_v4 = vpop.permute.xlu1 %953 }
 0x2d1   :  { %v958_v9 = vadd.f32 %v954_v4, %v3262_v21  ;;  %v2449_v21 = vor.u32 %v2842_v15, %v2448_v14  ;;  %v2386_v4 = vld [vmem:[#allocation5 + $0x78] sm:$0xf0] }
 0x2d2   :  { %v2389_v6 = vor.u32 %v2824_v3, %v2386_v4  ;;  %v2888_v3 = vld [vmem:[%s3414_s11 + $0x68] sm:$0xff]  ;;  %v2887_v4 = vld [vmem:[%s3414_s11 + $0x60] sm:$0xff] }
 0x2d3   :  { %v959_v12 = vpack.c.bf16 %v958_v9, %v957_v8  ;;  %v2514_v8 = vld [vmem:[#allocation5 + $0x178] sm:$0xf0]  ;;  %v2368_v9 = vld [vmem:[#allocation5 + $0x48] sm:$0xf] }
 0x2d4   :  { %v2517_v10 = vor.u32 %v2856_v7, %v2514_v8  ;;  %1498 = vmatpush.bf16.msrb.mxu0 %v2389_v6  ;;  %v2369_v14 = vor.u32 %v2822_v11, %v2368_v9  ;;  %v2886_v6 = vld [vmem:[%s3414_s11 + $0x58] sm:$0xff]  ;;  %v2879_v8 = vld [vmem:[%s3414_s11 + $0x20] sm:$0xff]  ;;  %v2885_v9 = vld [vmem:[%s3414_s11 + $0x50] sm:$0xff] }
 0x2d5   :  { %2324 = vmatmul.msk.bf16.vlgmr.msrb.gmra.mxu2 %vm978_vm1, %v959_v12  ;;  %2325 = vmatmul.msk.bf16.vlgmr.msrb.gmra.mxu3 %vm978_vm1, %v959_v12  ;;  %v2496_v12 = vld [vmem:[#allocation5 + $0x148] sm:$0xf]  ;;  %v2906_v7 = vld [vmem:[%s3414_s11 + $0xf8] sm:$0xff] }
 0x2d6   :  { %1466 = vmatpush.bf16.msrb.mxu2 %v2449_v21  ;;  %1480 = vmatpush.bf16.msrb.mxu3 %v2577_v20  ;;  %v2497_v15 = vor.u32 %v2854_v13, %v2496_v12  ;;  %v2370_v21 = vld [vmem:[#allocation5 + $0x58] sm:$0xf0]  ;;  %v2352_v20 = vld [vmem:[#allocation5 + $0x28] sm:$0xf] }
 0x2d7   :  { %1512 = vmatpush.bf16.msrb.mxu1 %v2517_v10  ;;  %v2373_v18 = vor.u32 %v2820_v16, %v2370_v21  ;;  %v2353_v27 = vor.u32 %v2818_v22, %v2352_v20  ;;  %v2905_v10 = vld [vmem:[%s3414_s11 + $0xf0] sm:$0xff]  ;;  %v2878_v11 = vld [vmem:[%s3414_s11 + $0x18] sm:$0xff]  ;;  %v2884_v13 = vld [vmem:[%s3414_s11 + $0x48] sm:$0xff] }
 0x2d8   :  { %v2898_v12 = vld [vmem:[%s3414_s11 + $0xb8] sm:$0xff]  ;;  %v2897_v16 = vld [vmem:[%s3414_s11 + $0xb0] sm:$0xff]  ;;  %v2883_v21 = vld [vmem:[%s3414_s11 + $0x40] sm:$0xff] }
 0x2d9   :  { %1499 = vmatpush.bf16.msrb.mxu0 %v2373_v18  ;;  %v2876_v18 = vld [vmem:[%s3414_s11 + $0x8] sm:$0xff]  ;;  %v2902_v20 = vld [vmem:[%s3414_s11 + $0xd8] sm:$0xff]  ;;  %v2875_v22 = vld [vmem:[%s3414_s11] sm:$0xff] }
 0x2da   :  { %1467 = vmatpush.bf16.msrb.mxu2 %v2433_v29  ;;  %1481 = vmatpush.bf16.msrb.mxu3 %v2561_v33  ;;  %v2848_v29 = vld [vmem:[#allocation5 + $0x12c] sm:$0xf]  ;;  %v2336_v33 = vld [vmem:[#allocation5 + $0x8] sm:$0xf] }
 0x2db   :  { %1513 = vmatpush.bf16.msrb.mxu1 %v2501_v23  ;;  %v2485_v36 = vor.u32 %v2848_v29, %v2482_v30  ;;  %v2337_v42 = vor.u32 %v2814_v34, %v2336_v33  ;;  %v2895_v23 = vld [vmem:[%s3414_s11 + $0xa0] sm:$0xff]  ;;  %v2892_v30 = vld [vmem:[%s3414_s11 + $0x88] sm:$0xff] }
 0x2dc   :  { %v1080_v29 = vld [vmem:[%s3413_s10] sm:$0xf] }
 0x2dd   :  { %1500 = vmatpush.bf16.msrb.mxu0 %v2357_v32  ;;  %v1083_v33 = vperm.slane %v1080_v29, 1  ;;  %v2891_v34 = vld [vmem:[%s3414_s11 + $0x80] sm:$0xff]  ;;  %v1082_v38 = vperm.slane %v1080_v29, 0 }
 0x2de   :  { %1468 = vmatpush.bf16.msrb.mxu2 %v2417_v41  ;;  %1482 = vmatpush.bf16.msrb.mxu3 %v2545_v45  ;;  %v2466_v41 = vld [vmem:[#allocation5 + $0x118] sm:$0xf0] }
 0x2df   :  { %1514 = vmatpush.bf16.msrb.mxu1 %v2485_v36  ;;  %v2469_v45 = vor.u32 %v2844_v40, %v2466_v41 }
 0x2e1   :  { %1501 = vmatpush.bf16.msrb.mxu0 %v2341_v44 }
 0x2e2   :  { %1469 = vmatpush.bf16.msrb.mxu2 %v2401_v53  ;;  %1483 = vmatpush.bf16.msrb.mxu3 %v2529_v57 }
 0x2e3   :  { %1515 = vmatpush.bf16.msrb.mxu1 %v2469_v45 }
 0x2e6   :  { %1470 = vmatpush.bf16.msrb.mxu2 %v2385_v1  ;;  %1484 = vmatpush.bf16.msrb.mxu3 %v2513_v5  ;;  %v2889_v1 = vld [vmem:[%s3414_s11 + $0x70] sm:$0xff]  ;;  %v2880_v5 = vld [vmem:[%s3414_s11 + $0x28] sm:$0xff] }
 0x2ea   :  { %1471 = vmatpush.bf16.msrb.mxu2 %v2369_v14  ;;  %1485 = vmatpush.bf16.msrb.mxu3 %v2497_v15  ;;  %v2904_v14 = vld [vmem:[%s3414_s11 + $0xe8] sm:$0xff]  ;;  %v2877_v15 = vld [vmem:[%s3414_s11 + $0x10] sm:$0xff] }
 0x2ee   :  { %1472 = vmatpush.bf16.msrb.mxu2 %v2353_v27  ;;  %1486 = vmatpush.bf16.msrb.mxu3 %v2481_v31  ;;  %v2893_v27 = vld [vmem:[%s3414_s11 + $0x90] sm:$0xff] }
 0x2f2   :  { %1473 = vmatpush.bf16.msrb.mxu2 %v2337_v42  ;;  %1487 = vmatpush.bf16.msrb.mxu3 %v2465_v43 }
 0x358   :  { %v991_v47 = vpop.f32.mrf.mxu2  ;;  %v1005_v48 = vpop.f32.mrf.mxu3 }
 0x359   :  { %v992_v51 = vadd.f32 %v991_v47, %v964_v49  ;;  %v1006_v52 = vadd.f32 %v1005_v48, %v965_v50 }
 0x35b   :  { %v1010_v57 = vmax.f32 %v992_v51, 0.0  ;;  %v1011_v58 = vmax.f32 %v1006_v52, 0.0 }
 0x360   :  { %v993_v53 = vpop.f32.mrf.mxu2  ;;  %v1007_v54 = vpop.f32.mrf.mxu3 }
 0x361   :  { %v994_v55 = vadd.f32 %v993_v53, %v964_v49  ;;  %v1008_v56 = vadd.f32 %v1007_v54, %v965_v50 }
 0x363   :  { %v1012_v59 = vmax.f32 %v994_v55, 0.0  ;;  %v1013_v60 = vmax.f32 %v1008_v56, 0.0  ;;  %v1085_v55 = vperm.slane %v1080_v29, 3 }
 0x365   :  { %v1014_v61 = vpack.c.bf16 %v1012_v59, %v1010_v57  ;;  %v1015_v62 = vpack.c.bf16 %v1013_v60, %v1011_v58 }
 0x367   :  { %1418 = vmatmul.bf16.vlgmr.msra.gmra.mxu2 %v1014_v61  ;;  %1432 = vmatmul.bf16.vlgmr.msra.gmra.mxu3 %v1015_v62 }
 0x368   :  { %1446 = vmatmul.bf16.vlgmr.msra.gmra.mxu0 %v1014_v61  ;;  %1460 = vmatmul.bf16.vlgmr.msra.gmra.mxu1 %v1015_v62 }
 0x369   :  { %1808 = vmatpush.bf16.msra.mxu3 %v2890_v63  ;;  %1794 = vmatpush.bf16.msra.mxu2 %v2882_v0 }
 0x36a   :  { %1836 = vmatpush.bf16.msra.mxu1 %v2906_v7  ;;  %1822 = vmatpush.bf16.msra.mxu0 %v2898_v12 }
 0x36d   :  { %1809 = vmatpush.bf16.msra.mxu3 %v2889_v1  ;;  %1795 = vmatpush.bf16.msra.mxu2 %v2881_v2 }
 0x36e   :  { %1837 = vmatpush.bf16.msra.mxu1 %v2905_v10  ;;  %1823 = vmatpush.bf16.msra.mxu0 %v2897_v16 }
 0x371   :  { %1810 = vmatpush.bf16.msra.mxu3 %v2888_v3  ;;  %1796 = vmatpush.bf16.msra.mxu2 %v2880_v5 }
 0x372   :  { %1838 = vmatpush.bf16.msra.mxu1 %v2904_v14  ;;  %1824 = vmatpush.bf16.msra.mxu0 %v2896_v19 }
 0x375   :  { %1811 = vmatpush.bf16.msra.mxu3 %v2887_v4  ;;  %1797 = vmatpush.bf16.msra.mxu2 %v2879_v8 }
 0x376   :  { %1839 = vmatpush.bf16.msra.mxu1 %v2903_v17  ;;  %1825 = vmatpush.bf16.msra.mxu0 %v2895_v23 }
 0x377   :  { %1474 = vmatmul.bf16.vlgmr.msrb.gmra.mxu2 %v1014_v61  ;;  %1488 = vmatmul.bf16.vlgmr.msrb.gmra.mxu3 %v1015_v62 }
 0x378   :  { %1502 = vmatmul.bf16.vlgmr.msrb.gmra.mxu0 %v1014_v61  ;;  %1516 = vmatmul.bf16.vlgmr.msrb.gmra.mxu1 %v1015_v62  ;;  %v1084_v62 = vperm.slane %v1080_v29, 2 }
 0x379   :  { %1812 = vmatpush.bf16.msra.mxu3 %v2886_v6  ;;  %1798 = vmatpush.bf16.msra.mxu2 %v2878_v11 }
 0x37a   :  { %1840 = vmatpush.bf16.msra.mxu1 %v2902_v20  ;;  %1826 = vmatpush.bf16.msra.mxu0 %v2894_v25 }
 0x37d   :  { %1813 = vmatpush.bf16.msra.mxu3 %v2885_v9  ;;  %1799 = vmatpush.bf16.msra.mxu2 %v2877_v15 }
 0x37e   :  { %1841 = vmatpush.bf16.msra.mxu1 %v2901_v24  ;;  %1827 = vmatpush.bf16.msra.mxu0 %v2893_v27 }
 0x381   :  { %1814 = vmatpush.bf16.msra.mxu3 %v2884_v13  ;;  %1800 = vmatpush.bf16.msra.mxu2 %v2876_v18 }
 0x382   :  { %1842 = vmatpush.bf16.msra.mxu1 %v2900_v26  ;;  %1828 = vmatpush.bf16.msra.mxu0 %v2892_v30 }
 0x385   :  { %1815 = vmatpush.bf16.msra.mxu3 %v2883_v21  ;;  %1801 = vmatpush.bf16.msra.mxu2 %v2875_v22  ;;  %v2917_v21 = vld [vmem:[%s3415_s12] ss:$0 sm:$0xff]  ;;  %s3016_s12 = smov [#allocation7]  }
 0x386   :  { %1843 = vmatpush.bf16.msra.mxu1 %v2899_v28  ;;  %1829 = vmatpush.bf16.msra.mxu0 %v2891_v34  ;;  %s1908_s24 = sshll.u32 %s3016_s12, 4  ;;  %s1909_s24 = int_to_ptr.vmem [resolvable:$true] %s1908_s24 }
 0x3e5   :  { %v1447_v31 = vpop.f32.mrf.mxu0  ;;  %v1461_v32 = vpop.f32.mrf.mxu1 }
 0x3e6   :  { %v1448_v35 = vadd.f32 %v1447_v31, %v1083_v33 }
 0x3e8   :  { %v1462_v41 = vadd.f32 %v1461_v32, %v1448_v35 }
 0x3ea   :  { %v1419_v36 = vpop.f32.mrf.mxu2  ;;  %v1433_v37 = vpop.f32.mrf.mxu3  ;;  %v1523_v45 = vmax.f32 %v1462_v41, 0.0 }
 0x3eb   :  { %v1420_v43 = vadd.f32 %v1419_v36, %v1082_v38 }
 0x3ed   :  { %v1449_v39 = vpop.f32.mrf.mxu0  ;;  %v1463_v40 = vpop.f32.mrf.mxu1  ;;  %v1434_v49 = vadd.f32 %v1433_v37, %v1420_v43 }
 0x3ee   :  { %v1450_v42 = vadd.f32 %v1449_v39, %v1083_v33 }
 0x3ef   :  { %v1522_v56 = vmax.f32 %v1434_v49, 0.0 }
 0x3f0   :  { %v1464_v44 = vadd.f32 %v1463_v40, %v1450_v42 }
 0x3f2   :  { %v1527_v46 = vmax.f32 %v1464_v44, 0.0  ;;  %v1421_v47 = vpop.f32.mrf.mxu2  ;;  %v1435_v48 = vpop.f32.mrf.mxu3 }
 0x3f3   :  { %v1422_v50 = vadd.f32 %v1421_v47, %v1082_v38  ;;  %v1891_v47 = vpop.permute.xlu2 %1890 }
 0x3f4   :  { %v1531_v51 = vpack.c.bf16 %v1527_v46, %v1523_v45 }
 0x3f5   :  { %v1436_v52 = vadd.f32 %v1435_v48, %v1422_v50  ;;  %v1503_v53 = vpop.f32.mrf.mxu0  ;;  %v1517_v54 = vpop.f32.mrf.mxu1 }
 0x3f6   :  { %1816 = vmatmul.bf16.vlgmr.msra.gmra.mxu3 %v1531_v51  ;;  %v1504_v59 = vadd.f32 %v1503_v53, %v1085_v55 }
 0x3f7   :  { %v1526_v57 = vmax.f32 %v1436_v52, 0.0 }
 0x3f8   :  { %v1518_v0 = vadd.f32 %v1517_v54, %v1504_v59 }
 0x3f9   :  { %v1530_v58 = vpack.c.bf16 %v1526_v57, %v1522_v56 }
 0x3fa   :  { %v1475_v60 = vpop.f32.mrf.mxu2  ;;  %v1489_v61 = vpop.f32.mrf.mxu3  ;;  %v1525_v5 = vmax.f32 %v1518_v0, 0.0 }
 0x3fb   :  { %1802 = vmatmul.bf16.vlgmr.msra.gmra.mxu2 %v1530_v58  ;;  %v1476_v2 = vadd.f32 %v1475_v60, %v1084_v62 }
 0x3fd   :  { %v1505_v63 = vpop.f32.mrf.mxu0  ;;  %v1519_v3 = vpop.f32.mrf.mxu1  ;;  %v1490_v8 = vadd.f32 %v1489_v61, %v1476_v2 }
 0x3fe   :  { %v1506_v1 = vadd.f32 %v1505_v63, %v1085_v55  ;;  %v1893_v61 = vpop.permute.xlu2 %1892 }
 0x3ff   :  { %v1524_v13 = vmax.f32 %v1490_v8, 0.0 }
 0x400   :  { %v1520_v4 = vadd.f32 %v1519_v3, %v1506_v1 }
 0x402   :  { %v1529_v6 = vmax.f32 %v1520_v4, 0.0  ;;  %v1477_v7 = vpop.f32.mrf.mxu2  ;;  %v1491_v11 = vpop.f32.mrf.mxu3 }
 0x403   :  { %v1478_v9 = vadd.f32 %v1477_v7, %v1084_v62 }
 0x404   :  { %v1533_v10 = vpack.c.bf16 %v1529_v6, %v1525_v5 }
 0x405   :  { %v1492_v12 = vadd.f32 %v1491_v11, %v1478_v9 }
 0x406   :  { %1844 = vmatmul.bf16.vlgmr.msra.gmra.mxu1 %v1533_v10 }
 0x407   :  { %v1528_v14 = vmax.f32 %v1492_v12, 0.0 }
 0x409   :  { %v1532_v15 = vpack.c.bf16 %v1528_v14, %v1524_v13 }
 0x40b   :  { %1830 = vmatmul.bf16.vlgmr.msra.gmra.mxu0 %v1532_v15 }
 0x479   :  { %v1817_v18 = vpop.f32.mrf.mxu3 }
 0x47e   :  { %v1803_v16 = vpop.f32.mrf.mxu2 }
 0x47f   :  { %v1804_v17 = vadd.f32 %v2917_v21, %v1803_v16 }
 0x481   :  { %v1818_v20 = vadd.f32 %v1817_v18, %v1804_v17  ;;  %v1819_v28 = vpop.f32.mrf.mxu3 }
 0x483   :  { %v1845_v19 = vpop.f32.mrf.mxu1 }
 0x486   :  { %v1805_v22 = vpop.f32.mrf.mxu2 }
 0x487   :  { %v1806_v25 = vadd.f32 %v2917_v21, %v1805_v22 }
 0x488   :  { %v1831_v23 = vpop.f32.mrf.mxu0 }
 0x489   :  { %v1832_v24 = vadd.f32 %v1831_v23, %v1818_v20  ;;  %v1820_v29 = vadd.f32 %v1819_v28, %v1806_v25 }
 0x48b   :  { %v1846_v26 = vadd.f32 %v1845_v19, %v1832_v24  ;;  %v1847_v32 = vpop.f32.mrf.mxu1 }
 0x48d   :  { %v2710_v27 = vmul.f32 -1.442695, %v1846_v26 }
 0x48f   :  { %2922 = vpow2.f32 %v2710_v27 }
 0x490   :  { %v1833_v30 = vpop.f32.mrf.mxu0 }
 0x491   :  { %v1834_v31 = vadd.f32 %v1833_v30, %v1820_v29 }
 0x493   :  { %v1848_v33 = vadd.f32 %v1847_v32, %v1834_v31 }
 0x495   :  { %v2923_v34 = vpop.eup %2922  ;;  %v2711_v35 = vmul.f32 -1.442695, %v1848_v33 }
 0x496   :  { %v1856_v36 = vadd.f32 1.0, %v2923_v34 }
 0x497   :  { %2924 = vpow2.f32 %v2711_v35 }
 0x498   :  { %2926 = vrcp.f32 %v1856_v36  ;;  %v1869_v42 = vand.u32 2147483648, %v1856_v36  ;;  %v1867_v44 = vand.u32 2147483647, %v1856_v36  ;;  %vm1863_vm3 = vweird.f32 %v1856_v36 }
 0x49a   :  { %v1870_v48 = vor.u32 1.1754944e-38, %v1869_v42  ;;  %vm1868_vm5 = vcmp.eq.f32.partialorder %v1867_v44, 8.507059e+37 }
 0x49d   :  { %v2925_v37 = vpop.eup %2924 }
 0x49e   :  { %v2927_v38 = vpop.eup %2926  ;;  %v1857_v39 = vadd.f32 1.0, %v2925_v37 }
 0x49f   :  { %v1859_v40 = vmul.f32 %v2927_v38, %v1856_v36  ;;  %vm1864_vm2 = vweird.f32 %v2927_v38 }
 0x4a0   :  { %2928 = vrcp.f32 %v1857_v39  ;;  %vm1865_vm4 = vmor %vm1863_vm3, %vm1864_vm2  ;;  %v1884_v54 = vand.u32 2147483648, %v1857_v39  ;;  %v1882_v57 = vand.u32 2147483647, %v1857_v39  ;;  %vm1878_vm9 = vweird.f32 %v1857_v39 }
 0x4a1   :  { %v1860_v41 = vsub.f32 1.0, %v1859_v40 }
 0x4a2   :  { %v1885_v59 = vor.u32 1.1754944e-38, %v1884_v54  ;;  %vm1883_vm11 = vcmp.eq.f32.partialorder %v1882_v57, 8.507059e+37 }
 0x4a3   :  { %v1861_v43 = vmul.f32 %v2927_v38, %v1860_v41 }
 0x4a5   :  { %v1862_v45 = vadd.f32 %v2927_v38, %v1861_v43 }
 0x4a6   :  { %v2929_v46 = vpop.eup %2928 }
 0x4a7   :  { %v1874_v49 = vmul.f32 %v2929_v46, %v1857_v39  ;;  %v1866_v50 = vsel %vm1865_vm4, %v2927_v38, %v1862_v45  ;;  %vm1879_vm8 = vweird.f32 %v2929_v46 }
 0x4a8   :  { %v1871_v51 = vsel %vm1868_vm5, %v1870_v48, %v1866_v50  ;;  %vm1880_vm10 = vmor %vm1878_vm9, %vm1879_vm8 }
 0x4a9   :  { %v1875_v52 = vsub.f32 1.0, %v1874_v49  ;;  %v1896_v53 = vsel %vm978_vm1, %v1871_v51, %v1891_v47 }
 0x4aa   :  { %v1899_v55 = vsel %vm1898_vm6, %v1896_v53, %v1891_v47 }
 0x4ab   :  { %v1876_v56 = vmul.f32 %v2929_v46, %v1875_v52  ;;  %1902 = vst.msk [vmem:[#allocation7] sm:$0xff] %vm1901_vm7, %v1899_v55 }
 0x4ad   :  { %v1877_v58 = vadd.f32 %v2929_v46, %v1876_v56 }
 0x4af   :  { %v1881_v60 = vsel %vm1880_vm10, %v2929_v46, %v1877_v58 }
 0x4b0   :  { %v1886_v62 = vsel %vm1883_vm11, %v1885_v59, %v1881_v60 }
 0x4b1   :  { %v1897_v63 = vsel %vm978_vm1, %v1886_v62, %v1893_v61 }
 0x4b2   :  { %v1900_v0 = vsel %vm1898_vm6, %v1897_v63, %v1893_v61 }
 0x4b3   :  { %1903 = vst.msk [vmem:[#allocation7 + $0x8] sm:$0xff] %vm1901_vm7, %v1900_v0 }
 0x4b4   :  { %1916 = dma.vmem_to_hbm [thread:$0]  %s1909_s24, 256, %s1911_s26, [#allocation4], %s3009_s16, %s3009_s16, %s3010_s17  }
 0x4b5   :  { %3006 = dma.done.wait [#allocation4], 256  }
 0x4b6   :  { %3007 = vsyncadd [#allocation4], 4294967040 }
 0x4b7   :  { %1921 = vsyncpa [#allocation3], 1 }
 0x4b8   :  { %1922 = vsyncpa [#allocation6], 1 }
 0x4b9   :  { %1923 = vsyncpa [#allocation4], 1 }

</bundles_post_ra>
